<compile_context>
chip_gen: v7x
topology: tpu7x:2x2x1
jax: 0.10.0
libtpu: 0.0.40
codegen_flags: <defaults>
</compile_context>

<pallas_src>
import math
import jax
import jax.numpy as jnp
from jax import lax
from jax.experimental import pallas as pl
from jax.experimental.pallas import tpu as pltpu

# ----------------------------- config (small synthetic sizes) ------------------------------
B = 128          # batch
SEQ = 16         # token sequence length fed to the (synthetic) frozen encoder
D = 32           # d_model (FinBERT hidden_size stand-in)
NUM_HEADS = 4    # adapter_heads (irrelevant to the math at seq_len == 1)
NUM_LAYERS = 2   # adapter_layer
NUM_LABELS = 3   # num_labels
EPS = 1e-6       # rmsnorm_eps
VOCAB = 64
TB = B           # batch tile == batch -> single grid step (overhead-bound kernel)
LANE_PAD = 128   # lane-dense output width (logits padded 3 -> 128, sliced in wrapper)


def _round_up(a, m):
    return ((a + m - 1) // m) * m


# --------------------------- parameter-slab layout constants --------------------------------
D4 = 4 * D
WCOLS = max(D4, LANE_PAD)                 # weight-slab lane width (128 here)
RPL = 6 * D                               # weight-slab rows per adapter layer (Wvo, W1, W2)
CW_ROW = NUM_LAYERS * RPL                 # classifier weight rows
GW_ROW = CW_ROW + D                       # gate weight rows
W_ROWS = _round_up(CW_ROW + 2 * D, 8)     # total weight-slab rows (448)
CB_ROW = 3 * NUM_LAYERS                   # classifier bias row
GB_ROW = CB_ROW + 1                       # gate bias row
B_ROWS = _round_up(3 * NUM_LAYERS + 2, 8) # total bias-slab rows (8)


# ----------------------------------- Pallas kernel ------------------------------------------
def adapter_kernel(cls_ref, w_ref, b_ref, out_ref):
    bf16 = jnp.bfloat16
    inv_sqrt2 = 1.0 / math.sqrt(2.0)

    cls_x = cls_ref[...].astype(jnp.float32)               # [TB, D]
    cls_bf = cls_x.astype(bf16)

    # --- adapter gate: Linear(D, L) + softmax over layers, hoisted before the layer loop.
    #     Gate weights live in the padded weight slab (extra lanes are zero -> sliced off).
    gl = jnp.dot(cls_bf, w_ref[GW_ROW:GW_ROW + D, :],
                 preferred_element_type=jnp.float32)[:, :NUM_LAYERS]
    gl = gl + b_ref[GB_ROW:GB_ROW + 1, :NUM_LAYERS]
    gl = gl - jnp.max(gl, axis=-1, keepdims=True)
    ge = jnp.exp(gl)
    gwts = ge / jnp.sum(ge, axis=-1, keepdims=True)         # [TB, NUM_LAYERS]

    x = cls_x
    fused = jnp.zeros_like(cls_x)

    for l in range(NUM_LAYERS):                             # static unroll over adapter blocks
        r = l * RPL
        # --- RMSNorm1 (gain folded into Wvo). Module: rms = sqrt(||x||_2^2 + eps).
        inv1 = lax.rsqrt(jnp.sum(x * x, axis=-1, keepdims=True) + EPS)
        xr = (x * inv1).astype(bf16)

        # --- self-attention over a length-1 sequence == out_proj(V); Wv@Wo folded -> 1 matmul.
        attn = (jnp.dot(xr, w_ref[r:r + D, :D], preferred_element_type=jnp.float32)
                + b_ref[3 * l:3 * l + 1, :D])
        x = x + attn                                        # dropout1 identity (eval mode)

        # --- RMSNorm2 (gain folded into W1) + MLP (Linear -> exact GELU -> Linear).
        inv2 = lax.rsqrt(jnp.sum(x * x, axis=-1, keepdims=True) + EPS)
        xr2 = (x * inv2).astype(bf16)
        h = (jnp.dot(xr2, w_ref[r + D:r + 2 * D, :D4], preferred_element_type=jnp.float32)
             + b_ref[3 * l + 1:3 * l + 2, :D4])
        h = 0.5 * h * (1.0 + lax.erf(h * inv_sqrt2))        # exact (erf) GELU, as nn.GELU()
        m = (jnp.dot(h.astype(bf16), w_ref[r + 2 * D:r + 6 * D, :D],
                     preferred_element_type=jnp.float32)
             + b_ref[3 * l + 2:3 * l + 3, :D])
        x = x + m                                           # MLP dropouts identity (eval mode)

        # --- weighted fusion accumulated in-loop (no per-layer activation list kept live)
        fused = fused + gwts[:, l:l + 1] * x

    combined = (cls_x + fused).astype(bf16)

    # --- classifier (weights zero-padded to 128 output lanes -> unmasked lane-dense store)
    logits = (jnp.dot(combined, w_ref[CW_ROW:CW_ROW + D, :LANE_PAD],
                      preferred_element_type=jnp.float32)
              + b_ref[CB_ROW:CB_ROW + 1, :LANE_PAD])        # [TB, 128]
    out_ref[...] = logits.astype(out_ref.dtype)


# ----------------------------------- wrapper -------------------------------------------------
def fin_adapter_head(cls_out, kp):
    Bb = cls_out.shape[0]
    assert Bb % TB == 0, "batch must be a multiple of the batch tile TB"
    grid = (Bb // TB,)
    sem = ("parallel",) if grid[0] > 1 else ("arbitrary",)

    out_padded = pl.pallas_call(
        adapter_kernel,
        out_shape=jax.ShapeDtypeStruct((Bb, LANE_PAD), jnp.bfloat16),
        grid=grid,
        in_specs=[pl.BlockSpec((TB, D), lambda i: (i, 0)),            # cls tile over batch
                  pl.BlockSpec((W_ROWS, WCOLS), lambda i: (0, 0)),    # bf16 weight slab (full)
                  pl.BlockSpec((B_ROWS, WCOLS), lambda i: (0, 0))],   # f32 bias slab (full)
        out_specs=pl.BlockSpec((TB, LANE_PAD), lambda i: (i, 0)),
        compiler_params=pltpu.CompilerParams(
            dimension_semantics=sem,
            vmem_limit_bytes=32 * 1024 * 1024,   # <= half of v7x's 64 MiB/TC; plenty here
        ),
    )(cls_out, kp['w'], kp['b'])
    return out_padded[:, :NUM_LABELS].astype(jnp.float32)   # drop lane padding, upcast


# ------------------------- deterministic parameter initialization ----------------------------
def init_torch_style_params(key):
    keys = iter(jax.random.split(key, 64))

    def u(shape, scale=0.2):
        return jax.random.uniform(next(keys), shape, jnp.float32, -scale, scale)

    layers = []
    for _ in range(NUM_LAYERS):
        layers.append(dict(
            n1w=jnp.ones((D,), jnp.float32),     # RMSNorm weight init = ones
            in_w=u((3 * D, D)),                  # nn.MultiheadAttention in_proj_weight
            in_b=u((3 * D,)),
            out_w=u((D, D)),                     # out_proj
            out_b=u((D,)),
            n2w=jnp.ones((D,), jnp.float32),
            w1=u((4 * D, D)), b1=u((4 * D,)),    # Linear(d, 4d)
            w2=u((D, 4 * D)), b2=u((D,)),        # Linear(4d, d)
        ))
    return dict(
        layers=layers,
        gate_w=u((NUM_LAYERS, D)), gate_b=u((NUM_LAYERS,)),
        cls_w=u((NUM_LABELS, D)), cls_b=u((NUM_LABELS,)),
        emb=u((VOCAB, D), 1.0),                  # synthetic "frozen FinBERT" embedding table
    )


def to_kernel_params(tp):
    """Fold out-proj / RMSNorm gains into weights and pack everything into 2 slabs."""
    wslab = jnp.zeros((W_ROWS, WCOLS), jnp.float32)
    bslab = jnp.zeros((B_ROWS, WCOLS), jnp.float32)

    for l, lp in enumerate(tp['layers']):
        wv_t = lp['in_w'][2 * D:3 * D, :].T                 # [D, D]  V slice of in_proj
        bv = lp['in_b'][2 * D:3 * D]                        # [D]
        wo_t = lp['out_w'].T                                # [D, D]
        wvo = lp['n1w'][:, None] * (wv_t @ wo_t)            # fold RMSNorm1 gain + out-proj
        bvo = bv @ wo_t + lp['out_b']
        w1_t = lp['n2w'][:, None] * lp['w1'].T              # fold RMSNorm2 gain    [D, 4D]
        w2_t = lp['w2'].T                                   # [4D, D]

        r = l * RPL
        wslab = wslab.at[r:r + D, :D].set(wvo)
        wslab = wslab.at[r + D:r + 2 * D, :D4].set(w1_t)
        wslab = wslab.at[r + 2 * D:r + 6 * D, :D].set(w2_t)
        bslab = bslab.at[3 * l + 0, :D].set(bvo)
        bslab = bslab.at[3 * l + 1, :D4].set(lp['b1'])
        bslab = bslab.at[3 * l + 2, :D].set(lp['b2'])

    # classifier padded to 128 output lanes; gate packed into the same slab (padded lanes = 0)
    wslab = wslab.at[CW_ROW:CW_ROW + D, :NUM_LABELS].set(tp['cls_w'].T)
    wslab = wslab.at[GW_ROW:GW_ROW + D, :NUM_LAYERS].set(tp['gate_w'].T)
    bslab = bslab.at[CB_ROW, :NUM_LABELS].set(tp['cls_b'])
    bslab = bslab.at[GB_ROW, :NUM_LAYERS].set(tp['gate_b'])

    return dict(w=wslab.astype(jnp.bfloat16), b=bslab)


# ------------------------------ pure-JAX reference (torch semantics) -------------------------
def ref_forward(cls_out, tp):
    Bb = cls_out.shape[0]
    x = cls_out[:, None, :]                                   # [B,1,D]
    outs = []
    hd = D // NUM_HEADS
    for lp in tp['layers']:
        rms = jnp.sqrt(jnp.sum(x * x, -1, keepdims=True) + EPS)
        xn = lp['n1w'] * x / rms
        qkv = xn @ lp['in_w'].T + lp['in_b']
        q, k, v = jnp.split(qkv, 3, axis=-1)
        sh = lambda t: t.reshape(Bb, 1, NUM_HEADS, hd).transpose(0, 2, 1, 3)
        qh, kh, vh = sh(q), sh(k), sh(v)
        scores = (qh @ kh.transpose(0, 1, 3, 2)) / math.sqrt(hd)
        w = jax.nn.softmax(scores, axis=-1)                   # softmax over a single key
        a = (w @ vh).transpose(0, 2, 1, 3).reshape(Bb, 1, D)
        x = x + (a @ lp['out_w'].T + lp['out_b'])
        rms2 = jnp.sqrt(jnp.sum(x * x, -1, keepdims=True) + EPS)
        xn2 = lp['n2w'] * x / rms2
        h = xn2 @ lp['w1'].T + lp['b1']
        h = 0.5 * h * (1.0 + jax.scipy.special.erf(h / math.sqrt(2.0)))
        x = x + (h @ lp['w2'].T + lp['b2'])
        outs.append(x[:, 0, :])
    stacked = jnp.stack(outs, axis=1)
    gwt = jax.nn.softmax(cls_out @ tp['gate_w'].T + tp['gate_b'], axis=-1)
    fused = jnp.sum(stacked * gwt[..., None], axis=1)
    combined = cls_out + fused
    return combined @ tp['cls_w'].T + tp['cls_b']


# ----------------------------------------- main ----------------------------------------------
if __name__ == "__main__":
    key = jax.random.PRNGKey(0)
    k_param, k_ids = jax.random.split(key)

    tparams = init_torch_style_params(k_param)
    kparams = to_kernel_params(tparams)

    input_ids = jax.random.randint(k_ids, (B, SEQ), 0, VOCAB, dtype=jnp.int32)
    attention_mask = jnp.ones((B, SEQ), dtype=jnp.int32)

    # TODO(synk): frozen pretrained FinBERT (AutoModel.from_pretrained) replaced by a
    # deterministic synthetic embedding lookup; attention_mask is unused in this stand-in.
    cls_output = tparams['emb'][input_ids[:, 0]]              # [B, D]  == hidden_states[:, 0, :]

    logits = fin_adapter_head(cls_output, kparams)
    jax.block_until_ready(logits)

    ref = ref_forward(cls_output, tparams)                    # f32 reference (torch semantics)
    assert logits.shape == (B, NUM_LABELS)
    # bf16 matmul operands + bf16 logit store (f32 accumulation) vs pure-f32 reference
    assert jnp.allclose(logits, ref, rtol=5e-2, atol=5e-2), (
        f"max abs err = {jnp.max(jnp.abs(logits - ref))}")

    print("KERNEL_OK")
</pallas_src>

<mosaic_0001>
module attributes {stable_mosaic.version = 11 : i64} {
  func.func @adapter_kernel(%arg0: i32, %arg1: memref<128x32xf32, #tpu.memory_space<vmem>>, %arg2: memref<448x128xbf16, #tpu.memory_space<vmem>>, %arg3: memref<8x128xf32, #tpu.memory_space<vmem>>, %arg4: memref<128x128xbf16, #tpu.memory_space<vmem>>) attributes {dimension_semantics = [#tpu.dimension_semantics<arbitrary>], iteration_bounds = array<i64: 1>, scalar_prefetch = 0 : i64, scratch_operands = 0 : i64, tpu.core_type = #tpu.core_type<tc>, window_params = [{transform_indices = @transform_0, window_bounds = array<i64: 128, 32>}, {pipeline_mode = #tpu.pipeline_mode<synchronous>, transform_indices = @transform_1, window_bounds = array<i64: 448, 128>}, {pipeline_mode = #tpu.pipeline_mode<synchronous>, transform_indices = @transform_2, window_bounds = array<i64: 8, 128>}, {transform_indices = @transform_3, window_bounds = array<i64: 128, 128>}]} {
    %c0 = arith.constant 0 : index
    %c0_0 = arith.constant 0 : index
    %0 = vector.load %arg1[%c0, %c0_0] : memref<128x32xf32, #tpu.memory_space<vmem>>, vector<128x32xf32>
    %1 = arith.truncf %0 : vector<128x32xf32> to vector<128x32xbf16>
    %c416 = arith.constant 416 : index
    %c0_1 = arith.constant 0 : index
    %2 = vector.load %arg2[%c416, %c0_1] : memref<448x128xbf16, #tpu.memory_space<vmem>>, vector<32x128xbf16>
    %cst = arith.constant dense<0.000000e+00> : vector<128x128xf32>
    %3 = tpu.matmul %1, %2, %cst {dimension_numbers = #tpu.dot_dimension_numbers<[1], [0], [0], [1], [0, 0, 1, 1], [], []>} : vector<128x32xbf16>, vector<32x128xbf16>, vector<128x128xf32> -> vector<128x128xf32>
    %4 = vector.extract_strided_slice %3 {offsets = [0, 0], sizes = [128, 2], strides = [1, 1]} : vector<128x128xf32> to vector<128x2xf32>
    %c7 = arith.constant 7 : index
    %c0_2 = arith.constant 0 : index
    %5 = vector.load %arg3[%c7, %c0_2] : memref<8x128xf32, #tpu.memory_space<vmem>>, vector<1x2xf32>
    %6 = vector.broadcast %5 : vector<1x2xf32> to vector<128x2xf32>
    %7 = arith.addf %4, %6 : vector<128x2xf32>
    %cst_3 = arith.constant dense<0xFF800000> : vector<128xf32>
    %8 = vector.multi_reduction <maximumf>, %7, %cst_3 [1] : vector<128x2xf32> to vector<128xf32>
    %9 = vector.shape_cast %8 : vector<128xf32> to vector<128x1xf32>
    %10 = vector.broadcast %9 : vector<128x1xf32> to vector<128x2xf32>
    %11 = arith.subf %7, %10 : vector<128x2xf32>
    %12 = math.exp %11 : vector<128x2xf32>
    %cst_4 = arith.constant dense<0.000000e+00> : vector<128xf32>
    %13 = vector.multi_reduction <add>, %12, %cst_4 [1] : vector<128x2xf32> to vector<128xf32>
    %14 = vector.shape_cast %13 : vector<128xf32> to vector<128x1xf32>
    %15 = vector.broadcast %14 : vector<128x1xf32> to vector<128x2xf32>
    %16 = arith.divf %12, %15 : vector<128x2xf32>
    %cst_5 = arith.constant 0.000000e+00 : f32
    %17 = vector.broadcast %cst_5 : f32 to vector<128x32xf32>
    %18 = arith.mulf %0, %0 : vector<128x32xf32>
    %cst_6 = arith.constant dense<0.000000e+00> : vector<128xf32>
    %19 = vector.multi_reduction <add>, %18, %cst_6 [1] : vector<128x32xf32> to vector<128xf32>
    %20 = vector.shape_cast %19 : vector<128xf32> to vector<128x1xf32>
    %cst_7 = arith.constant 9.99999997E-7 : f32
    %21 = vector.broadcast %cst_7 : f32 to vector<128x1xf32>
    %22 = arith.addf %20, %21 : vector<128x1xf32>
    %23 = math.rsqrt %22 : vector<128x1xf32>
    %24 = vector.broadcast %23 : vector<128x1xf32> to vector<128x32xf32>
    %25 = arith.mulf %0, %24 : vector<128x32xf32>
    %26 = arith.truncf %25 : vector<128x32xf32> to vector<128x32xbf16>
    %c0_8 = arith.constant 0 : index
    %c0_9 = arith.constant 0 : index
    %27 = vector.load %arg2[%c0_8, %c0_9] : memref<448x128xbf16, #tpu.memory_space<vmem>>, vector<32x32xbf16>
    %cst_10 = arith.constant dense<0.000000e+00> : vector<128x32xf32>
    %28 = tpu.matmul %26, %27, %cst_10 {dimension_numbers = #tpu.dot_dimension_numbers<[1], [0], [0], [1], [0, 0, 1, 1], [], []>} : vector<128x32xbf16>, vector<32x32xbf16>, vector<128x32xf32> -> vector<128x32xf32>
    %c0_11 = arith.constant 0 : index
    %c0_12 = arith.constant 0 : index
    %29 = vector.load %arg3[%c0_11, %c0_12] : memref<8x128xf32, #tpu.memory_space<vmem>>, vector<1x32xf32>
    %30 = vector.broadcast %29 : vector<1x32xf32> to vector<128x32xf32>
    %31 = arith.addf %28, %30 : vector<128x32xf32>
    %32 = arith.addf %0, %31 : vector<128x32xf32>
    %33 = arith.mulf %32, %32 : vector<128x32xf32>
    %cst_13 = arith.constant dense<0.000000e+00> : vector<128xf32>
    %34 = vector.multi_reduction <add>, %33, %cst_13 [1] : vector<128x32xf32> to vector<128xf32>
    %35 = vector.shape_cast %34 : vector<128xf32> to vector<128x1xf32>
    %cst_14 = arith.constant 9.99999997E-7 : f32
    %36 = vector.broadcast %cst_14 : f32 to vector<128x1xf32>
    %37 = arith.addf %35, %36 : vector<128x1xf32>
    %38 = math.rsqrt %37 : vector<128x1xf32>
    %39 = vector.broadcast %38 : vector<128x1xf32> to vector<128x32xf32>
    %40 = arith.mulf %32, %39 : vector<128x32xf32>
    %41 = arith.truncf %40 : vector<128x32xf32> to vector<128x32xbf16>
    %c32 = arith.constant 32 : index
    %c0_15 = arith.constant 0 : index
    %42 = vector.load %arg2[%c32, %c0_15] : memref<448x128xbf16, #tpu.memory_space<vmem>>, vector<32x128xbf16>
    %cst_16 = arith.constant dense<0.000000e+00> : vector<128x128xf32>
    %43 = tpu.matmul %41, %42, %cst_16 {dimension_numbers = #tpu.dot_dimension_numbers<[1], [0], [0], [1], [0, 0, 1, 1], [], []>} : vector<128x32xbf16>, vector<32x128xbf16>, vector<128x128xf32> -> vector<128x128xf32>
    %c1 = arith.constant 1 : index
    %c0_17 = arith.constant 0 : index
    %44 = vector.load %arg3[%c1, %c0_17] : memref<8x128xf32, #tpu.memory_space<vmem>>, vector<1x128xf32>
    %45 = vector.broadcast %44 : vector<1x128xf32> to vector<128x128xf32>
    %46 = arith.addf %43, %45 : vector<128x128xf32>
    %cst_18 = arith.constant 5.000000e-01 : f32
    %47 = vector.broadcast %cst_18 : f32 to vector<128x128xf32>
    %48 = arith.mulf %47, %46 : vector<128x128xf32>
    %cst_19 = arith.constant 0.707106769 : f32
    %49 = vector.broadcast %cst_19 : f32 to vector<128x128xf32>
    %50 = arith.mulf %46, %49 : vector<128x128xf32>
    %51 = math.erf %50 : vector<128x128xf32>
    %cst_20 = arith.constant 1.000000e+00 : f32
    %52 = vector.broadcast %cst_20 : f32 to vector<128x128xf32>
    %53 = arith.addf %52, %51 : vector<128x128xf32>
    %54 = arith.mulf %48, %53 : vector<128x128xf32>
    %55 = arith.truncf %54 : vector<128x128xf32> to vector<128x128xbf16>
    %c64 = arith.constant 64 : index
    %c0_21 = arith.constant 0 : index
    %56 = vector.load %arg2[%c64, %c0_21] : memref<448x128xbf16, #tpu.memory_space<vmem>>, vector<128x32xbf16>
    %cst_22 = arith.constant dense<0.000000e+00> : vector<128x32xf32>
    %57 = tpu.matmul %55, %56, %cst_22 {dimension_numbers = #tpu.dot_dimension_numbers<[1], [0], [0], [1], [0, 0, 1, 1], [], []>} : vector<128x128xbf16>, vector<128x32xbf16>, vector<128x32xf32> -> vector<128x32xf32>
    %c2 = arith.constant 2 : index
    %c0_23 = arith.constant 0 : index
    %58 = vector.load %arg3[%c2, %c0_23] : memref<8x128xf32, #tpu.memory_space<vmem>>, vector<1x32xf32>
    %59 = vector.broadcast %58 : vector<1x32xf32> to vector<128x32xf32>
    %60 = arith.addf %57, %59 : vector<128x32xf32>
    %61 = arith.addf %32, %60 : vector<128x32xf32>
    %62 = vector.extract_strided_slice %16 {offsets = [0, 0], sizes = [128, 1], strides = [1, 1]} : vector<128x2xf32> to vector<128x1xf32>
    %63 = vector.broadcast %62 : vector<128x1xf32> to vector<128x32xf32>
    %64 = arith.mulf %63, %61 : vector<128x32xf32>
    %65 = arith.addf %17, %64 : vector<128x32xf32>
    %66 = arith.mulf %61, %61 : vector<128x32xf32>
    %cst_24 = arith.constant dense<0.000000e+00> : vector<128xf32>
    %67 = vector.multi_reduction <add>, %66, %cst_24 [1] : vector<128x32xf32> to vector<128xf32>
    %68 = vector.shape_cast %67 : vector<128xf32> to vector<128x1xf32>
    %cst_25 = arith.constant 9.99999997E-7 : f32
    %69 = vector.broadcast %cst_25 : f32 to vector<128x1xf32>
    %70 = arith.addf %68, %69 : vector<128x1xf32>
    %71 = math.rsqrt %70 : vector<128x1xf32>
    %72 = vector.broadcast %71 : vector<128x1xf32> to vector<128x32xf32>
    %73 = arith.mulf %61, %72 : vector<128x32xf32>
    %74 = arith.truncf %73 : vector<128x32xf32> to vector<128x32xbf16>
    %c192 = arith.constant 192 : index
    %c0_26 = arith.constant 0 : index
    %75 = vector.load %arg2[%c192, %c0_26] : memref<448x128xbf16, #tpu.memory_space<vmem>>, vector<32x32xbf16>
    %cst_27 = arith.constant dense<0.000000e+00> : vector<128x32xf32>
    %76 = tpu.matmul %74, %75, %cst_27 {dimension_numbers = #tpu.dot_dimension_numbers<[1], [0], [0], [1], [0, 0, 1, 1], [], []>} : vector<128x32xbf16>, vector<32x32xbf16>, vector<128x32xf32> -> vector<128x32xf32>
    %c3 = arith.constant 3 : index
    %c0_28 = arith.constant 0 : index
    %77 = vector.load %arg3[%c3, %c0_28] : memref<8x128xf32, #tpu.memory_space<vmem>>, vector<1x32xf32>
    %78 = vector.broadcast %77 : vector<1x32xf32> to vector<128x32xf32>
    %79 = arith.addf %76, %78 : vector<128x32xf32>
    %80 = arith.addf %61, %79 : vector<128x32xf32>
    %81 = arith.mulf %80, %80 : vector<128x32xf32>
    %cst_29 = arith.constant dense<0.000000e+00> : vector<128xf32>
    %82 = vector.multi_reduction <add>, %81, %cst_29 [1] : vector<128x32xf32> to vector<128xf32>
    %83 = vector.shape_cast %82 : vector<128xf32> to vector<128x1xf32>
    %cst_30 = arith.constant 9.99999997E-7 : f32
    %84 = vector.broadcast %cst_30 : f32 to vector<128x1xf32>
    %85 = arith.addf %83, %84 : vector<128x1xf32>
    %86 = math.rsqrt %85 : vector<128x1xf32>
    %87 = vector.broadcast %86 : vector<128x1xf32> to vector<128x32xf32>
    %88 = arith.mulf %80, %87 : vector<128x32xf32>
    %89 = arith.truncf %88 : vector<128x32xf32> to vector<128x32xbf16>
    %c224 = arith.constant 224 : index
    %c0_31 = arith.constant 0 : index
    %90 = vector.load %arg2[%c224, %c0_31] : memref<448x128xbf16, #tpu.memory_space<vmem>>, vector<32x128xbf16>
    %cst_32 = arith.constant dense<0.000000e+00> : vector<128x128xf32>
    %91 = tpu.matmul %89, %90, %cst_32 {dimension_numbers = #tpu.dot_dimension_numbers<[1], [0], [0], [1], [0, 0, 1, 1], [], []>} : vector<128x32xbf16>, vector<32x128xbf16>, vector<128x128xf32> -> vector<128x128xf32>
    %c4 = arith.constant 4 : index
    %c0_33 = arith.constant 0 : index
    %92 = vector.load %arg3[%c4, %c0_33] : memref<8x128xf32, #tpu.memory_space<vmem>>, vector<1x128xf32>
    %93 = vector.broadcast %92 : vector<1x128xf32> to vector<128x128xf32>
    %94 = arith.addf %91, %93 : vector<128x128xf32>
    %cst_34 = arith.constant 5.000000e-01 : f32
    %95 = vector.broadcast %cst_34 : f32 to vector<128x128xf32>
    %96 = arith.mulf %95, %94 : vector<128x128xf32>
    %cst_35 = arith.constant 0.707106769 : f32
    %97 = vector.broadcast %cst_35 : f32 to vector<128x128xf32>
    %98 = arith.mulf %94, %97 : vector<128x128xf32>
    %99 = math.erf %98 : vector<128x128xf32>
    %cst_36 = arith.constant 1.000000e+00 : f32
    %100 = vector.broadcast %cst_36 : f32 to vector<128x128xf32>
    %101 = arith.addf %100, %99 : vector<128x128xf32>
    %102 = arith.mulf %96, %101 : vector<128x128xf32>
    %103 = arith.truncf %102 : vector<128x128xf32> to vector<128x128xbf16>
    %c256 = arith.constant 256 : index
    %c0_37 = arith.constant 0 : index
    %104 = vector.load %arg2[%c256, %c0_37] : memref<448x128xbf16, #tpu.memory_space<vmem>>, vector<128x32xbf16>
    %cst_38 = arith.constant dense<0.000000e+00> : vector<128x32xf32>
    %105 = tpu.matmul %103, %104, %cst_38 {dimension_numbers = #tpu.dot_dimension_numbers<[1], [0], [0], [1], [0, 0, 1, 1], [], []>} : vector<128x128xbf16>, vector<128x32xbf16>, vector<128x32xf32> -> vector<128x32xf32>
    %c5 = arith.constant 5 : index
    %c0_39 = arith.constant 0 : index
    %106 = vector.load %arg3[%c5, %c0_39] : memref<8x128xf32, #tpu.memory_space<vmem>>, vector<1x32xf32>
    %107 = vector.broadcast %106 : vector<1x32xf32> to vector<128x32xf32>
    %108 = arith.addf %105, %107 : vector<128x32xf32>
    %109 = arith.addf %80, %108 : vector<128x32xf32>
    %110 = vector.extract_strided_slice %16 {offsets = [0, 1], sizes = [128, 1], strides = [1, 1]} : vector<128x2xf32> to vector<128x1xf32>
    %111 = vector.broadcast %110 : vector<128x1xf32> to vector<128x32xf32>
    %112 = arith.mulf %111, %109 : vector<128x32xf32>
    %113 = arith.addf %65, %112 : vector<128x32xf32>
    %114 = arith.addf %0, %113 : vector<128x32xf32>
    %115 = arith.truncf %114 : vector<128x32xf32> to vector<128x32xbf16>
    %c384 = arith.constant 384 : index
    %c0_40 = arith.constant 0 : index
    %116 = vector.load %arg2[%c384, %c0_40] : memref<448x128xbf16, #tpu.memory_space<vmem>>, vector<32x128xbf16>
    %cst_41 = arith.constant dense<0.000000e+00> : vector<128x128xf32>
    %117 = tpu.matmul %115, %116, %cst_41 {dimension_numbers = #tpu.dot_dimension_numbers<[1], [0], [0], [1], [0, 0, 1, 1], [], []>} : vector<128x32xbf16>, vector<32x128xbf16>, vector<128x128xf32> -> vector<128x128xf32>
    %c6 = arith.constant 6 : index
    %c0_42 = arith.constant 0 : index
    %118 = vector.load %arg3[%c6, %c0_42] : memref<8x128xf32, #tpu.memory_space<vmem>>, vector<1x128xf32>
    %119 = vector.broadcast %118 : vector<1x128xf32> to vector<128x128xf32>
    %120 = arith.addf %117, %119 : vector<128x128xf32>
    %121 = arith.truncf %120 : vector<128x128xf32> to vector<128x128xbf16>
    %c0_43 = arith.constant 0 : index
    %c0_44 = arith.constant 0 : index
    %122 = vector.load %arg4[%c0_43, %c0_44] : memref<128x128xbf16, #tpu.memory_space<vmem>>, vector<128x128xbf16>
    tpu.vector_store %arg4[%c0_43, %c0_44], %121 {strides = array<i32>} : memref<128x128xbf16, #tpu.memory_space<vmem>>, vector<128x128xbf16>,
    return
  }
  func.func @transform_0(%arg0: i32) -> (i32, i32) {
    %c0_i32 = arith.constant 0 : i32
    %c0_i32_0 = arith.constant 0 : i32
    return %arg0, %c0_i32 : i32, i32
  }
  func.func @transform_1(%arg0: i32) -> (i32, i32) {
    %c0_i32 = arith.constant 0 : i32
    %c0_i32_0 = arith.constant 0 : i32
    %c0_i32_1 = arith.constant 0 : i32
    return %c0_i32, %c0_i32_0 : i32, i32
  }
  func.func @transform_2(%arg0: i32) -> (i32, i32) {
    %c0_i32 = arith.constant 0 : i32
    %c0_i32_0 = arith.constant 0 : i32
    %c0_i32_1 = arith.constant 0 : i32
    return %c0_i32, %c0_i32_0 : i32, i32
  }
  func.func @transform_3(%arg0: i32) -> (i32, i32) {
    %c0_i32 = arith.constant 0 : i32
    %c0_i32_0 = arith.constant 0 : i32
    return %arg0, %c0_i32 : i32, i32
  }
}

</mosaic_0001>

<bundles_post_ra>
// kernel: tpu_custom_call.1
= control target key start
LH: loop header
LB: loop body
LE: loop exit
PB: predicated region body
PF: predicated region fallthrough
CT: control target
= control target key end

     0   :  { %8 = vsyncpa [#allocation3], 0  ;;  %s4446_s0 = inlined_call_operand.vmem [shape: f32[128,32], index: 0, kind: input, shape index: {}]   ;;  %s4447_s1 = inlined_call_operand.hbm [shape: bf16[448,128], index: 1, kind: input, shape index: {}]   ;;  %s4448_s2 = inlined_call_operand.vmem [shape: f32[8,128], index: 2, kind: input, shape index: {}]   ;;  %s4449_s3 = inlined_call_operand.hbm [shape: bf16[128,128], index: 3, kind: output, shape index: {}]  }
   0x1   :  { %9 = vsyncpa [#allocation4], 0  ;;  %s3292_s12 = smov [#allocation2]   ;;  %s3244_s16 = scalar_lea.hbm %s4447_s1, 3584 }
   0x2   :  { %s17_s13 = sshll.u32 %s3292_s12, 4  ;;  %p3245_p0 = scmp.ne.s32.totalorder %s4447_s1, %s3244_s16  ;;  %s18_s13 = int_to_ptr.vmem [resolvable:$true] %s17_s13 }
   0x3   :  { %p3248_p1 = scmp.lt.u32.totalorder %s3244_s16, %s4447_s1 }
   0x5   :  { %p3250_p2 = pnand %p3248_p1, %p3245_p0 }
   0x7   :  { %3253 = shalt.err (!%p3250_p2)
}
   0x8   :  { %s3254_s21 = scalar_lea.vmem %s18_s13, 3584  ;;  %p3259_p4 = scmp.lt.s32.totalorder %s18_s13, %s18_s13 }
   0x9   :  { %p3255_p3 = scmp.ne.s32.totalorder %s18_s13, %s3254_s21  ;;  %p3260_p5 = scmp.lt.s32.totalorder %s3254_s21, %s3254_s21 }
   0xb   :  { %p3261_p6 = por %p3260_p5, %p3259_p4 }
   0xd   :  { %p3262_p7 = pnand %p3261_p6, %p3255_p3 }
   0xf   :  { %3265 = shalt.err (!%p3262_p7)
}
  0x10   :  { %s3293_s22 = smov 64   ;;  %s3294_s23 = smov 4  }
  0x11   :  { %23 = dma.hbm_to_vmem [thread:$0]  %s4447_s1, 3584, %s18_s13, [#allocation3], %s3293_s22, %s3293_s22, %s3294_s23  }
  0x12   :  { %3288 = dma.done.wait [#allocation3], 3584  }
  0x13   :  { %3289 = vsyncadd [#allocation3], 4294963712  ;;  %v3336_v0 = vld [vmem:[%s4446_s0 + $0x10] sm:$0xff]  ;;  %vm70_vm0 = vcmask 261120   ;;  %v3341_v1 = vld [vmem:[%s4446_s0] sm:$0xff]  ;;  %vm213_vm1 = vcmask 15360  }
  0x14   :  { %v3346_v2 = vld [vmem:[%s4446_s0 + $0x18] sm:$0xff]  ;;  %v392_v3 = vmul.f32 %v3336_v0, %v3336_v0  ;;  %v390_v4 = vmul.f32 %v3341_v1, %v3341_v1  ;;  %v3357_v6 = vld [vmem:[%s4446_s0 + $0x8] sm:$0xff]  ;;  %v3367_v8 = vld [vmem:[%s4446_s0 + $0x20] sm:$0xff] }
  0x15   :  { %v393_v5 = vmul.f32 %v3346_v2, %v3346_v2  ;;  %v3362_v7 = vld [vmem:[%s4446_s0 + $0x28] sm:$0xff]  ;;  %v391_v9 = vmul.f32 %v3357_v6, %v3357_v6  ;;  %v3374_v10 = vld [vmem:[%s4446_s0 + $0x38] sm:$0xff]  ;;  %v3379_v11 = vld [vmem:[%s4446_s0 + $0x30] sm:$0xff]  ;;  %v394_v16 = vmul.f32 %v3367_v8, %v3367_v8 }
  0x16   :  { %v3384_v12 = vld [vmem:[%s4446_s0 + $0x48] sm:$0xff]  ;;  %v412_v13 = vsel %vm70_vm0, %v392_v3, 0.0  ;;  %v406_v14 = vsel %vm70_vm0, %v390_v4, 0.0  ;;  %v395_v15 = vmul.f32 %v3362_v7, %v3362_v7  ;;  %v3395_v17 = vld [vmem:[%s4446_s0 + $0x40] sm:$0xff]  ;;  %v3400_v18 = vld [vmem:[%s4446_s0 + $0x58] sm:$0xff]  ;;  %v397_v21 = vmul.f32 %v3374_v10, %v3374_v10 }
  0x17   :  { %v3405_v19 = vld [vmem:[%s4446_s0 + $0x50] sm:$0xff]  ;;  %413 = vadd.xlane.f32.xlu1 %v412_v13  ;;  %407 = vadd.xlane.f32.xlu0 %v406_v14  ;;  %v415_v20 = vsel %vm70_vm0, %v393_v5, 0.0  ;;  %v396_v22 = vmul.f32 %v3379_v11, %v3379_v11  ;;  %v3415_v23 = vld [vmem:[%s4446_s0 + $0x68] sm:$0xff]  ;;  %v3420_v24 = vld [vmem:[%s4446_s0 + $0x60] sm:$0xff]  ;;  %v409_v25 = vsel %vm70_vm0, %v391_v9, 0.0  ;;  %v399_v26 = vmul.f32 %v3384_v12, %v3384_v12 }
  0x18   :  { %v398_v27 = vmul.f32 %v3395_v17, %v3395_v17  ;;  %v401_v28 = vmul.f32 %v3400_v18, %v3400_v18  ;;  %v400_v29 = vmul.f32 %v3405_v19, %v3405_v19  ;;  %v403_v30 = vmul.f32 %v3415_v23, %v3415_v23  ;;  %v3448_v42 = vld [vmem:[%s4446_s0 + $0x78] sm:$0xff]  ;;  %v3453_v43 = vld [vmem:[%s4446_s0 + $0x70] sm:$0xff]  ;;  %v2944_v48 = vld [vmem:[#allocation2] sm:$0xff]  }
  0x19   :  { %v402_v31 = vmul.f32 %v3420_v24, %v3420_v24  ;;  %v421_v32 = vsel %vm70_vm0, %v395_v15, 0.0  ;;  %v418_v33 = vsel %vm70_vm0, %v394_v16, 0.0  ;;  %v427_v34 = vsel %vm70_vm0, %v397_v21, 0.0  ;;  %2756 = vmatprep.subr.bf16.mxu1 %v2944_v48  ;;  %v2945_v49 = vld [vmem:[#allocation2 + $0x8] sm:$0xff]  }
  0x1a   :  { %v424_v35 = vsel %vm70_vm0, %v396_v22, 0.0  ;;  %v433_v36 = vsel %vm70_vm0, %v399_v26, 0.0  ;;  %v430_v37 = vsel %vm70_vm0, %v398_v27, 0.0  ;;  %v439_v38 = vsel %vm70_vm0, %v401_v28, 0.0  ;;  %2757 = vmatpush3.bf16.msra.mxu1 %v2944_v48 }
  0x1b   :  { %416 = vadd.xlane.f32.xlu1 %v415_v20  ;;  %410 = vadd.xlane.f32.xlu0 %v409_v25  ;;  %v436_v39 = vsel %vm70_vm0, %v400_v29, 0.0  ;;  %v445_v40 = vsel %vm70_vm0, %v403_v30, 0.0  ;;  %v442_v41 = vsel %vm70_vm0, %v402_v31, 0.0  ;;  %v405_v44 = vmul.f32 %v3448_v42, %v3448_v42 }
  0x1c   :  { %v404_v45 = vmul.f32 %v3453_v43, %v3453_v43  ;;  %2758 = vmatprep.subr.bf16.mxu1 %v2945_v49 }
  0x1d   :  { %v451_v46 = vsel %vm70_vm0, %v405_v44, 0.0 }
  0x1e   :  { %v448_v47 = vsel %vm70_vm0, %v404_v45, 0.0  ;;  %2759 = vmatpush3.bf16.msra.mxu1 %v2945_v49 }
  0x1f   :  { %422 = vadd.xlane.f32.xlu1 %v421_v32  ;;  %419 = vadd.xlane.f32.xlu0 %v418_v33 }
  0x23   :  { %428 = vadd.xlane.f32.xlu1 %v427_v34  ;;  %425 = vadd.xlane.f32.xlu0 %v424_v35 }
  0x27   :  { %434 = vadd.xlane.f32.xlu1 %v433_v36  ;;  %431 = vadd.xlane.f32.xlu0 %v430_v37 }
  0x2b   :  { %440 = vadd.xlane.f32.xlu1 %v439_v38  ;;  %437 = vadd.xlane.f32.xlu0 %v436_v39 }
  0x2f   :  { %446 = vadd.xlane.f32.xlu1 %v445_v40  ;;  %443 = vadd.xlane.f32.xlu0 %v442_v41 }
  0x33   :  { %452 = vadd.xlane.f32.xlu1 %v451_v46  ;;  %449 = vadd.xlane.f32.xlu0 %v448_v47 }
  0xa4   :  { %v414_v50 = vpop.xlane.xlu1 %413  ;;  %v408_v51 = vpop.xlane.xlu0 %407 }
  0xa5   :  { %v456_v52 = vadd.f32 1e-06, %v414_v50  ;;  %v454_v53 = vadd.f32 1e-06, %v408_v51 }
  0xa7   :  { %2972 = vrsqrt.f32 %v456_v52 }
  0xa8   :  { %v417_v54 = vpop.xlane.xlu1 %416  ;;  %v411_v55 = vpop.xlane.xlu0 %410  ;;  %2974 = vrsqrt.f32 %v454_v53 }
  0xa9   :  { %v457_v56 = vadd.f32 1e-06, %v417_v54  ;;  %v455_v57 = vadd.f32 1e-06, %v411_v55 }
  0xab   :  { %2976 = vrsqrt.f32 %v457_v56 }
  0xac   :  { %2978 = vrsqrt.f32 %v455_v57  ;;  %v423_v58 = vpop.xlane.xlu1 %422  ;;  %v420_v59 = vpop.xlane.xlu0 %419 }
  0xad   :  { %v459_v60 = vadd.f32 1e-06, %v423_v58  ;;  %v458_v61 = vadd.f32 1e-06, %v420_v59 }
  0xaf   :  { %2980 = vrsqrt.f32 %v459_v60 }
  0xb0   :  { %2982 = vrsqrt.f32 %v458_v61  ;;  %v429_v62 = vpop.xlane.xlu1 %428  ;;  %v426_v63 = vpop.xlane.xlu0 %425 }
  0xb1   :  { %v461_v3 = vadd.f32 1e-06, %v429_v62  ;;  %v460_v4 = vadd.f32 1e-06, %v426_v63  ;;  %v2973_v5 = vpop.eup %2972 }
  0xb2   :  { %v2975_v9 = vpop.eup %2974  ;;  %v488_v22 = vmul.f32 %v2973_v5, %v3336_v0 }
  0xb3   :  { %2984 = vrsqrt.f32 %v461_v3  ;;  %v486_v26 = vmul.f32 %v2975_v9, %v3341_v1 }
  0xb4   :  { %2986 = vrsqrt.f32 %v460_v4  ;;  %v435_v13 = vpop.xlane.xlu1 %434  ;;  %v432_v14 = vpop.xlane.xlu0 %431 }
  0xb5   :  { %v2977_v15 = vpop.eup %2976  ;;  %v463_v16 = vadd.f32 1e-06, %v435_v13  ;;  %v462_v20 = vadd.f32 1e-06, %v432_v14 }
  0xb6   :  { %v2979_v21 = vpop.eup %2978  ;;  %v489_v25 = vmul.f32 %v2977_v15, %v3346_v2 }
  0xb7   :  { %2988 = vrsqrt.f32 %v463_v16  ;;  %v487_v27 = vmul.f32 %v2979_v21, %v3357_v6 }
  0xb8   :  { %2990 = vrsqrt.f32 %v462_v20  ;;  %v441_v28 = vpop.xlane.xlu1 %440  ;;  %v438_v29 = vpop.xlane.xlu0 %437  ;;  %v503_v30 = vpack.c.bf16 %v489_v25, %v488_v22  ;;  %v2946_v22 = vld [vmem:[#allocation2 + $0xd0] sm:$0xff]   ;;  %v2947_v25 = vld [vmem:[#allocation2 + $0xd8] sm:$0xff]  }
  0xb9   :  { %v2981_v31 = vpop.eup %2980  ;;  %v465_v32 = vadd.f32 1e-06, %v441_v28  ;;  %v464_v33 = vadd.f32 1e-06, %v438_v29  ;;  %v502_v34 = vpack.c.bf16 %v487_v27, %v486_v26  ;;  %v46_v26 = vpack.c.bf16 %v3357_v6, %v3341_v1  ;;  %2736 = vmatprep.subr.bf16.mxu0 %v2946_v22  ;;  %v2948_v27 = vld [vmem:[#allocation2 + $0x10] sm:$0xff]  }
  0xba   :  { %v2983_v35 = vpop.eup %2982  ;;  %v491_v36 = vmul.f32 %v2981_v31, %v3362_v7  ;;  %2737 = vmatpush3.bf16.msra.mxu0 %v2946_v22  ;;  %v47_v28 = vpack.c.bf16 %v3346_v2, %v3336_v0  ;;  %v48_v29 = vpack.c.bf16 %v3362_v7, %v3367_v8  ;;  %v3500_v31 = vld [vmem:[%s4448_s2] ss:$0 sm:$0xff] }
  0xbb   :  { %2992 = vrsqrt.f32 %v465_v32  ;;  %2760 = vmatprep.mubr.msk.bf16.mxu1 %vm70_vm0, %v502_v34  ;;  %v490_v37 = vmul.f32 %v2983_v35, %v3367_v8  ;;  %2740 = vmatprep.mubr.msk.bf16.mxu0 %vm70_vm0, %v46_v26 }
  0xbc   :  { %2994 = vrsqrt.f32 %v464_v33  ;;  %2761 = vmatmul.mubr.msk.bf16.vlgmr.msra.gmra.mrb[0].mxu1 %vm70_vm0, %v503_v30  ;;  %v447_v38 = vpop.xlane.xlu1 %446  ;;  %v444_v39 = vpop.xlane.xlu0 %443  ;;  %2738 = vmatprep.subr.bf16.mxu0 %v2947_v25  ;;  %v49_v30 = vpack.c.bf16 %v3374_v10, %v3379_v11 }
  0xbd   :  { %v2985_v40 = vpop.eup %2984  ;;  %v467_v41 = vadd.f32 1e-06, %v447_v38  ;;  %v466_v44 = vadd.f32 1e-06, %v444_v39  ;;  %v504_v45 = vpack.c.bf16 %v491_v36, %v490_v37 }
  0xbe   :  { %v2987_v46 = vpop.eup %2986  ;;  %v493_v47 = vmul.f32 %v2985_v40, %v3374_v10  ;;  %2739 = vmatpush3.bf16.msra.mxu0 %v2947_v25 }
  0xbf   :  { %2996 = vrsqrt.f32 %v467_v41  ;;  %2764 = vmatprep.mubr.msk.bf16.mxu1 %vm70_vm0, %v504_v45  ;;  %v492_v48 = vmul.f32 %v2987_v46, %v3379_v11  ;;  %2776 = vmatprep.subr.bf16.mxu0 %v2948_v27 }
  0xc0   :  { %2998 = vrsqrt.f32 %v466_v44  ;;  %v453_v49 = vpop.xlane.xlu1 %452  ;;  %v450_v50 = vpop.xlane.xlu0 %449 }
  0xc1   :  { %v2989_v51 = vpop.eup %2988  ;;  %v469_v52 = vadd.f32 1e-06, %v453_v49  ;;  %v468_v53 = vadd.f32 1e-06, %v450_v50  ;;  %v505_v54 = vpack.c.bf16 %v493_v47, %v492_v48  ;;  %2741 = vmatmul.mubr.msk.bf16.vlgmr.msra.gmra.mrb[0].mxu0 %vm70_vm0, %v47_v28 }
  0xc2   :  { %v2991_v55 = vpop.eup %2990  ;;  %v495_v56 = vmul.f32 %v2989_v51, %v3384_v12  ;;  %2777 = vmatpush3.bf16.msra.mxu0 %v2948_v27  ;;  %2744 = vmatprep.mubr.msk.bf16.mxu0 %vm70_vm0, %v48_v29 }
  0xc3   :  { %3000 = vrsqrt.f32 %v469_v52  ;;  %v494_v57 = vmul.f32 %v2991_v55, %v3395_v17 }
  0xc4   :  { %3002 = vrsqrt.f32 %v468_v53  ;;  %2765 = vmatmul.mubr.msk.bf16.gmra.mrb[4].mxu1 %vm70_vm0, %v505_v54 }
  0xc5   :  { %v2993_v58 = vpop.eup %2992  ;;  %v506_v59 = vpack.c.bf16 %v495_v56, %v494_v57 }
  0xc6   :  { %v2995_v60 = vpop.eup %2994  ;;  %v497_v61 = vmul.f32 %v2993_v58, %v3400_v18 }
  0xc7   :  { %2768 = vmatprep.mubr.msk.bf16.mxu1 %vm70_vm0, %v506_v59  ;;  %v496_v62 = vmul.f32 %v2995_v60, %v3405_v19 }
  0xc9   :  { %v2997_v63 = vpop.eup %2996  ;;  %v507_v3 = vpack.c.bf16 %v497_v61, %v496_v62  ;;  %2745 = vmatmul.mubr.msk.bf16.gmra.mrb[4].mxu0 %vm70_vm0, %v49_v30 }
  0xca   :  { %v2999_v4 = vpop.eup %2998  ;;  %v499_v5 = vmul.f32 %v2997_v63, %v3415_v23 }
  0xcb   :  { %v498_v9 = vmul.f32 %v2999_v4, %v3420_v24 }
  0xcc   :  { %2769 = vmatmul.mubr.msk.bf16.gmra.mrb[8].mxu1 %vm70_vm0, %v507_v3 }
  0xcd   :  { %v3001_v13 = vpop.eup %3000  ;;  %v508_v14 = vpack.c.bf16 %v499_v5, %v498_v9 }
  0xce   :  { %v3003_v15 = vpop.eup %3002  ;;  %v501_v16 = vmul.f32 %v3001_v13, %v3448_v42 }
  0xcf   :  { %2772 = vmatprep.mubr.msk.bf16.mxu1 %vm70_vm0, %v508_v14  ;;  %v500_v20 = vmul.f32 %v3003_v15, %v3453_v43 }
  0xd1   :  { %v509_v21 = vpack.c.bf16 %v501_v16, %v500_v20 }
  0xd4   :  { %2773 = vmatmul.mubr.msk.bf16.gmra.mrb[12].mxu1 %vm70_vm0, %v509_v21 }
 0x18f   :  { %v2762_v32 = vpop.f32.mrb[0].mxu1 }
 0x190   :  { %v598_v33 = vadd.f32 %v2762_v32, %v3500_v31  ;;  %v589_v34 = vpop.f32.mrb[1].mxu1 }
 0x191   :  { %v590_v35 = vadd.f32 %v3500_v31, %v589_v34  ;;  %v2763_v36 = vpop.f32.mrb[2].mxu1  ;;  %v50_v34 = vpack.c.bf16 %v3384_v12, %v3395_v17 }
 0x192   :  { %v601_v37 = vadd.f32 %v2763_v36, %v3500_v31  ;;  %v592_v38 = vpop.f32.mrb[3].mxu1  ;;  %v3506_v39 = vadd.f32 %v598_v33, %v3336_v0 }
 0x193   :  { %v3509_v40 = vadd.f32 %v590_v35, %v3341_v1  ;;  %v593_v41 = vadd.f32 %v3500_v31, %v592_v38  ;;  %2748 = vmatprep.mubr.msk.bf16.mxu0 %vm70_vm0, %v50_v34 }
 0x194   :  { %v3513_v44 = vadd.f32 %v601_v37, %v3346_v2  ;;  %v670_v1 = vmul.f32 %v3506_v39, %v3506_v39  ;;  %v51_v37 = vpack.c.bf16 %v3400_v18, %v3405_v19 }
 0x195   :  { %v3516_v45 = vadd.f32 %v593_v41, %v3357_v6  ;;  %v668_v46 = vmul.f32 %v3509_v40, %v3509_v40 }
 0x196   :  { %v671_v52 = vmul.f32 %v3513_v44, %v3513_v44  ;;  %v690_v58 = vsel %vm70_vm0, %v670_v1, 0.0  ;;  %2749 = vmatmul.mubr.msk.bf16.gmra.mrb[8].mxu0 %vm70_vm0, %v51_v37 }
 0x197   :  { %v2766_v47 = vpop.f32.mrb[4].mxu1  ;;  %v684_v48 = vsel %vm70_vm0, %v668_v46, 0.0  ;;  %v669_v0 = vmul.f32 %v3516_v45, %v3516_v45 }
 0x198   :  { %v614_v49 = vadd.f32 %v2766_v47, %v3500_v31  ;;  %685 = vadd.xlane.f32.xlu0 %v684_v48  ;;  %v605_v2 = vpop.f32.mrb[5].mxu1  ;;  %v693_v61 = vsel %vm70_vm0, %v671_v52, 0.0  ;;  %v52_v52 = vpack.c.bf16 %v3415_v23, %v3420_v24 }
 0x199   :  { %v606_v50 = vadd.f32 %v3500_v31, %v605_v2  ;;  %v2767_v6 = vpop.f32.mrb[6].mxu1  ;;  %v687_v51 = vsel %vm70_vm0, %v669_v0, 0.0 }
 0x19a   :  { %v617_v53 = vadd.f32 %v2767_v6, %v3500_v31  ;;  %688 = vadd.xlane.f32.xlu1 %v687_v51  ;;  %v608_v54 = vpop.f32.mrb[7].mxu1  ;;  %v3532_v55 = vadd.f32 %v614_v49, %v3379_v11  ;;  %2752 = vmatprep.mubr.msk.bf16.mxu0 %vm70_vm0, %v52_v52 }
 0x19b   :  { %v3535_v56 = vadd.f32 %v606_v50, %v3367_v8  ;;  %v609_v57 = vadd.f32 %v3500_v31, %v608_v54 }
 0x19c   :  { %691 = vadd.xlane.f32.xlu0 %v690_v58  ;;  %v3540_v59 = vadd.f32 %v617_v53, %v3374_v10  ;;  %v674_v3 = vmul.f32 %v3532_v55, %v3532_v55  ;;  %v53_v53 = vpack.c.bf16 %v3448_v42, %v3453_v43 }
 0x19d   :  { %v3543_v60 = vadd.f32 %v609_v57, %v3362_v7  ;;  %v672_v11 = vmul.f32 %v3535_v56, %v3535_v56 }
 0x19e   :  { %694 = vadd.xlane.f32.xlu1 %v693_v61  ;;  %v675_v13 = vmul.f32 %v3540_v59, %v3540_v59  ;;  %v702_v22 = vsel %vm70_vm0, %v674_v3, 0.0  ;;  %2753 = vmatmul.mubr.msk.bf16.gmra.mrb[12].mxu0 %vm70_vm0, %v53_v53 }
 0x19f   :  { %v2770_v62 = vpop.f32.mrb[8].mxu1  ;;  %v696_v8 = vsel %vm70_vm0, %v672_v11, 0.0  ;;  %v673_v63 = vmul.f32 %v3543_v60, %v3543_v60 }
 0x1a0   :  { %v630_v10 = vadd.f32 %v2770_v62, %v3500_v31  ;;  %697 = vadd.xlane.f32.xlu0 %v696_v8  ;;  %v621_v7 = vpop.f32.mrb[9].mxu1  ;;  %v705_v27 = vsel %vm70_vm0, %v675_v13, 0.0 }
 0x1a1   :  { %v622_v4 = vadd.f32 %v3500_v31, %v621_v7  ;;  %v2771_v5 = vpop.f32.mrb[10].mxu1  ;;  %v699_v9 = vsel %vm70_vm0, %v673_v63, 0.0 }
 0x1a2   :  { %v633_v14 = vadd.f32 %v2771_v5, %v3500_v31  ;;  %700 = vadd.xlane.f32.xlu1 %v699_v9  ;;  %v624_v15 = vpop.f32.mrb[11].mxu1  ;;  %v3560_v16 = vadd.f32 %v630_v10, %v3405_v19 }
 0x1a3   :  { %v3563_v20 = vadd.f32 %v622_v4, %v3395_v17  ;;  %v625_v21 = vadd.f32 %v3500_v31, %v624_v15 }
 0x1a4   :  { %703 = vadd.xlane.f32.xlu0 %v702_v22  ;;  %v3568_v25 = vadd.f32 %v633_v14, %v3400_v18  ;;  %v678_v33 = vmul.f32 %v3560_v16, %v3560_v16 }
 0x1a5   :  { %v3571_v26 = vadd.f32 %v625_v21, %v3384_v12  ;;  %v676_v28 = vmul.f32 %v3563_v20, %v3563_v20 }
 0x1a6   :  { %706 = vadd.xlane.f32.xlu1 %v705_v27  ;;  %v679_v47 = vmul.f32 %v3568_v25, %v3568_v25  ;;  %v714_v0 = vsel %vm70_vm0, %v678_v33, 0.0 }
 0x1a7   :  { %v2774_v29 = vpop.f32.mrb[12].mxu1  ;;  %v708_v30 = vsel %vm70_vm0, %v676_v28, 0.0  ;;  %v677_v32 = vmul.f32 %v3571_v26, %v3571_v26 }
 0x1a8   :  { %v646_v35 = vadd.f32 %v2774_v29, %v3500_v31  ;;  %709 = vadd.xlane.f32.xlu0 %v708_v30  ;;  %v637_v36 = vpop.f32.mrb[13].mxu1  ;;  %v717_v2 = vsel %vm70_vm0, %v679_v47, 0.0 }
 0x1a9   :  { %v638_v38 = vadd.f32 %v3500_v31, %v637_v36  ;;  %v2775_v41 = vpop.f32.mrb[14].mxu1  ;;  %v711_v46 = vsel %vm70_vm0, %v677_v32, 0.0 }
 0x1aa   :  { %v649_v48 = vadd.f32 %v2775_v41, %v3500_v31  ;;  %712 = vadd.xlane.f32.xlu1 %v711_v46  ;;  %v640_v12 = vpop.f32.mrb[15].mxu1  ;;  %v3594_v17 = vadd.f32 %v646_v35, %v3453_v43  ;;  %v3626_v43 = vpop.f32.mrb[0].mxu0 }
 0x1ab   :  { %v3597_v18 = vadd.f32 %v638_v38, %v3420_v24  ;;  %v641_v19 = vadd.f32 %v3500_v31, %v640_v12  ;;  %v2950_v24 = vld [vmem:[#allocation2 + $0x20] sm:$0xff]   ;;  %v3628_v11 = vpop.f32.mrb[1].mxu0 }
 0x1ac   :  { %715 = vadd.xlane.f32.xlu0 %v714_v0  ;;  %v3602_v1 = vadd.f32 %v649_v48, %v3448_v42  ;;  %v682_v51 = vmul.f32 %v3594_v17, %v3594_v17  ;;  %v2951_v42 = vld [vmem:[#allocation2 + $0x28] sm:$0xff]   ;;  %2796 = vmatprep.subr.bf16.mxu1 %v2950_v24  ;;  %v3630_v62 = vpop.f32.mrb[2].mxu0 }
 0x1ad   :  { %v3605_v49 = vadd.f32 %v641_v19, %v3415_v23  ;;  %v680_v50 = vmul.f32 %v3597_v18, %v3597_v18  ;;  %v2949_v23 = vld [vmem:[#allocation2 + $0x18] sm:$0xff]   ;;  %2797 = vmatpush3.bf16.msra.mxu1 %v2950_v24  ;;  %v3632_v8 = vpop.f32.mrb[3].mxu0 }
 0x1ae   :  { %718 = vadd.xlane.f32.xlu1 %v717_v2  ;;  %v683_v57 = vmul.f32 %v3602_v1, %v3602_v1  ;;  %v726_v58 = vsel %vm70_vm0, %v682_v51, 0.0  ;;  %2778 = vmatprep.subr.bf16.mxu0 %v2949_v23  ;;  %v3634_v63 = vpop.f32.mrb[4].mxu0 }
 0x1af   :  { %v720_v6 = vsel %vm70_vm0, %v680_v50, 0.0  ;;  %v681_v31 = vmul.f32 %v3605_v49, %v3605_v49  ;;  %2779 = vmatpush3.bf16.msra.mxu0 %v2949_v23  ;;  %2798 = vmatprep.subr.bf16.mxu1 %v2951_v42  ;;  %v3636_v3 = vpop.f32.mrb[5].mxu0 }
 0x1b0   :  { %721 = vadd.xlane.f32.xlu0 %v720_v6  ;;  %v729_v61 = vsel %vm70_vm0, %v683_v57, 0.0  ;;  %v3638_v10 = vpop.f32.mrb[6].mxu0 }
 0x1b1   :  { %v723_v54 = vsel %vm70_vm0, %v681_v31, 0.0  ;;  %2799 = vmatpush3.bf16.msra.mxu1 %v2951_v42  ;;  %v3640_v7 = vpop.f32.mrb[7].mxu0 }
 0x1b2   :  { %724 = vadd.xlane.f32.xlu1 %v723_v54 }
 0x1b4   :  { %727 = vadd.xlane.f32.xlu0 %v726_v58 }
 0x1b6   :  { %730 = vadd.xlane.f32.xlu1 %v729_v61 }
 0x225   :  { %v686_v4 = vpop.xlane.xlu0 %685 }
 0x226   :  { %v732_v5 = vadd.f32 1e-06, %v686_v4 }
 0x227   :  { %v689_v9 = vpop.xlane.xlu1 %688 }
 0x228   :  { %3004 = vrsqrt.f32 %v732_v5  ;;  %v733_v13 = vadd.f32 1e-06, %v689_v9 }
 0x229   :  { %v692_v14 = vpop.xlane.xlu0 %691 }
 0x22a   :  { %3006 = vrsqrt.f32 %v733_v13  ;;  %v734_v15 = vadd.f32 1e-06, %v692_v14 }
 0x22b   :  { %v695_v21 = vpop.xlane.xlu1 %694 }
 0x22c   :  { %3008 = vrsqrt.f32 %v734_v15  ;;  %v735_v22 = vadd.f32 1e-06, %v695_v21 }
 0x22d   :  { %v698_v27 = vpop.xlane.xlu0 %697 }
 0x22e   :  { %3010 = vrsqrt.f32 %v735_v22  ;;  %v736_v28 = vadd.f32 1e-06, %v698_v27 }
 0x22f   :  { %v701_v29 = vpop.xlane.xlu1 %700 }
 0x230   :  { %3012 = vrsqrt.f32 %v736_v28  ;;  %v737_v30 = vadd.f32 1e-06, %v701_v29 }
 0x231   :  { %v704_v32 = vpop.xlane.xlu0 %703 }
 0x232   :  { %v3005_v33 = vpop.eup %3004  ;;  %3014 = vrsqrt.f32 %v737_v30  ;;  %v738_v34 = vadd.f32 1e-06, %v704_v32 }
 0x233   :  { %v707_v35 = vpop.xlane.xlu1 %706  ;;  %v764_v41 = vmul.f32 %v3005_v33, %v3509_v40 }
 0x234   :  { %v3007_v36 = vpop.eup %3006  ;;  %3016 = vrsqrt.f32 %v738_v34  ;;  %v739_v37 = vadd.f32 1e-06, %v707_v35 }
 0x235   :  { %v710_v38 = vpop.xlane.xlu0 %709  ;;  %v765_v46 = vmul.f32 %v3007_v36, %v3516_v45 }
 0x236   :  { %v3009_v47 = vpop.eup %3008  ;;  %3018 = vrsqrt.f32 %v739_v37  ;;  %v740_v48 = vadd.f32 1e-06, %v710_v38 }
 0x237   :  { %v713_v12 = vpop.xlane.xlu1 %712  ;;  %v780_v19 = vpack.c.bf16 %v765_v46, %v764_v41  ;;  %v766_v50 = vmul.f32 %v3009_v47, %v3506_v39 }
 0x238   :  { %v3011_v0 = vpop.eup %3010  ;;  %3020 = vrsqrt.f32 %v740_v48  ;;  %v741_v2 = vadd.f32 1e-06, %v713_v12 }
 0x239   :  { %v767_v6 = vmul.f32 %v3011_v0, %v3513_v44  ;;  %v716_v31 = vpop.xlane.xlu0 %715  ;;  %2780 = vmatprep.mubr.msk.bf16.mxu0 %vm70_vm0, %v780_v19 }
 0x23a   :  { %v3013_v51 = vpop.eup %3012  ;;  %3022 = vrsqrt.f32 %v741_v2  ;;  %v742_v52 = vadd.f32 1e-06, %v716_v31 }
 0x23b   :  { %v781_v53 = vpack.c.bf16 %v767_v6, %v766_v50  ;;  %v719_v54 = vpop.xlane.xlu1 %718  ;;  %v768_v23 = vmul.f32 %v3013_v51, %v3535_v56 }
 0x23c   :  { %v3015_v57 = vpop.eup %3014  ;;  %3024 = vrsqrt.f32 %v742_v52  ;;  %v743_v58 = vadd.f32 1e-06, %v719_v54 }
 0x23d   :  { %v722_v61 = vpop.xlane.xlu0 %721  ;;  %2781 = vmatmul.mubr.msk.bf16.vlgmr.msra.gmra.mrb[16].mxu0 %vm70_vm0, %v781_v53  ;;  %v769_v24 = vmul.f32 %v3015_v57, %v3543_v60 }
 0x23e   :  { %v3017_v42 = vpop.eup %3016  ;;  %3026 = vrsqrt.f32 %v743_v58  ;;  %v744_v4 = vadd.f32 1e-06, %v722_v61 }
 0x23f   :  { %v725_v5 = vpop.xlane.xlu1 %724  ;;  %v782_v9 = vpack.c.bf16 %v769_v24, %v768_v23  ;;  %v770_v21 = vmul.f32 %v3017_v42, %v3532_v55 }
 0x240   :  { %v3019_v13 = vpop.eup %3018  ;;  %3028 = vrsqrt.f32 %v744_v4  ;;  %v745_v14 = vadd.f32 1e-06, %v725_v5  ;;  %v2952_v4 = vld [vmem:[#allocation2 + $0x30] sm:$0xff]   ;;  %v2953_v5 = vld [vmem:[#allocation2 + $0x38] sm:$0xff]  }
 0x241   :  { %v728_v15 = vpop.xlane.xlu0 %727  ;;  %2784 = vmatprep.mubr.msk.bf16.mxu0 %vm70_vm0, %v782_v9  ;;  %v771_v22 = vmul.f32 %v3019_v13, %v3540_v59  ;;  %2800 = vmatprep.subr.bf16.mxu1 %v2952_v4  ;;  %v2954_v9 = vld [vmem:[#allocation2 + $0x40] sm:$0xff]   ;;  %v2955_v13 = vld [vmem:[#allocation2 + $0x48] sm:$0xff]  }
 0x242   :  { %v3021_v27 = vpop.eup %3020  ;;  %3030 = vrsqrt.f32 %v745_v14  ;;  %v746_v28 = vadd.f32 1e-06, %v728_v15  ;;  %2801 = vmatpush3.bf16.msra.mxu1 %v2952_v4  ;;  %v2956_v14 = vld [vmem:[#allocation2 + $0x50] sm:$0xff]   ;;  %v2957_v15 = vld [vmem:[#allocation2 + $0x58] sm:$0xff]  }
 0x243   :  { %v731_v29 = vpop.xlane.xlu1 %730  ;;  %v783_v30 = vpack.c.bf16 %v771_v22, %v770_v21  ;;  %v772_v34 = vmul.f32 %v3021_v27, %v3563_v20  ;;  %2802 = vmatprep.subr.bf16.mxu1 %v2953_v5  ;;  %v3685_v21 = vld [vmem:[%s4448_s2 + $0x1] ss:$0 sm:$0xff] }
 0x244   :  { %v3023_v32 = vpop.eup %3022  ;;  %3032 = vrsqrt.f32 %v746_v28  ;;  %v747_v33 = vadd.f32 1e-06, %v731_v29 }
 0x245   :  { %2785 = vmatmul.mubr.msk.bf16.gmra.mrb[20].mxu0 %vm70_vm0, %v783_v30  ;;  %v773_v35 = vmul.f32 %v3023_v32, %v3571_v26 }
 0x246   :  { %v3025_v36 = vpop.eup %3024  ;;  %3034 = vrsqrt.f32 %v747_v33  ;;  %2803 = vmatpush3.bf16.msra.mxu1 %v2953_v5 }
 0x247   :  { %v784_v37 = vpack.c.bf16 %v773_v35, %v772_v34  ;;  %v774_v41 = vmul.f32 %v3025_v36, %v3560_v16  ;;  %2804 = vmatprep.subr.bf16.mxu1 %v2954_v9 }
 0x248   :  { %v3027_v38 = vpop.eup %3026 }
 0x249   :  { %2788 = vmatprep.mubr.msk.bf16.mxu0 %vm70_vm0, %v784_v37  ;;  %v775_v46 = vmul.f32 %v3027_v38, %v3568_v25 }
 0x24a   :  { %v3029_v47 = vpop.eup %3028  ;;  %2805 = vmatpush3.bf16.msra.mxu1 %v2954_v9 }
 0x24b   :  { %v785_v48 = vpack.c.bf16 %v775_v46, %v774_v41  ;;  %v776_v19 = vmul.f32 %v3029_v47, %v3597_v18  ;;  %2806 = vmatprep.subr.bf16.mxu1 %v2955_v13 }
 0x24c   :  { %v3031_v12 = vpop.eup %3030 }
 0x24d   :  { %2789 = vmatmul.mubr.msk.bf16.gmra.mrb[24].mxu0 %vm70_vm0, %v785_v48  ;;  %v777_v0 = vmul.f32 %v3031_v12, %v3605_v49 }
 0x24e   :  { %v3033_v2 = vpop.eup %3032  ;;  %2807 = vmatpush3.bf16.msra.mxu1 %v2955_v13 }
 0x24f   :  { %v786_v50 = vpack.c.bf16 %v777_v0, %v776_v19  ;;  %v778_v31 = vmul.f32 %v3033_v2, %v3594_v17  ;;  %2808 = vmatprep.subr.bf16.mxu1 %v2956_v14 }
 0x250   :  { %v3035_v6 = vpop.eup %3034 }
 0x251   :  { %2792 = vmatprep.mubr.msk.bf16.mxu0 %vm70_vm0, %v786_v50  ;;  %v779_v51 = vmul.f32 %v3035_v6, %v3602_v1 }
 0x252   :  { %2809 = vmatpush3.bf16.msra.mxu1 %v2956_v14 }
 0x253   :  { %v787_v52 = vpack.c.bf16 %v779_v51, %v778_v31  ;;  %2810 = vmatprep.subr.bf16.mxu1 %v2957_v15 }
 0x255   :  { %2793 = vmatmul.mubr.msk.bf16.gmra.mrb[28].mxu0 %vm70_vm0, %v787_v52 }
 0x256   :  { %2811 = vmatpush3.bf16.msra.mxu1 %v2957_v15 }
 0x269   :  { %v3666_v53 = vpop.f32.mrb[8].mxu0 }
 0x26a   :  { %v3668_v54 = vpop.f32.mrb[9].mxu0 }
 0x26b   :  { %v3670_v57 = vpop.f32.mrb[10].mxu0 }
 0x26c   :  { %v3672_v58 = vpop.f32.mrb[11].mxu0 }
 0x271   :  { %v3674_v61 = vpop.f32.mrb[12].mxu0 }
 0x272   :  { %v3676_v23 = vpop.f32.mrb[13].mxu0 }
 0x273   :  { %v3678_v24 = vpop.f32.mrb[14].mxu0 }
 0x274   :  { %v3680_v42 = vpop.f32.mrb[15].mxu0 }
 0x310   :  { %v2782_v22 = vpop.f32.mrb[16].mxu0 }
 0x311   :  { %v876_v27 = vadd.f32 %v2782_v22, %v3685_v21  ;;  %v867_v28 = vpop.f32.mrb[17].mxu0 }
 0x312   :  { %v868_v29 = vadd.f32 %v3685_v21, %v867_v28  ;;  %v2783_v30 = vpop.f32.mrb[18].mxu0 }
 0x313   :  { %v948_v32 = vmul.f32 0.70710677, %v876_v27  ;;  %v879_v33 = vadd.f32 %v2783_v30, %v3685_v21  ;;  %v870_v34 = vpop.f32.mrb[19].mxu0  ;;  %v932_v30 = vmul.f32 0.5, %v876_v27 }
 0x314   :  { %v946_v35 = vmul.f32 0.70710677, %v868_v29  ;;  %v871_v36 = vadd.f32 %v3685_v21, %v870_v34 }
 0x315   :  { %3036 = verf.f32 %v948_v32  ;;  %v949_v37 = vmul.f32 0.70710677, %v879_v33  ;;  %v933_v32 = vmul.f32 0.5, %v879_v33 }
 0x316   :  { %3038 = verf.f32 %v946_v35  ;;  %v947_v38 = vmul.f32 0.70710677, %v871_v36 }
 0x317   :  { %3040 = verf.f32 %v949_v37 }
 0x318   :  { %3042 = verf.f32 %v947_v38  ;;  %v2786_v41 = vpop.f32.mrb[20].mxu0  ;;  %v930_v38 = vmul.f32 0.5, %v868_v29 }
 0x319   :  { %v892_v46 = vadd.f32 %v2786_v41, %v3685_v21  ;;  %v883_v47 = vpop.f32.mrb[21].mxu0  ;;  %v931_v41 = vmul.f32 0.5, %v871_v36 }
 0x31a   :  { %v884_v48 = vadd.f32 %v3685_v21, %v883_v47  ;;  %v2787_v12 = vpop.f32.mrb[22].mxu0 }
 0x31b   :  { %v952_v19 = vmul.f32 0.70710677, %v892_v46  ;;  %v895_v0 = vadd.f32 %v2787_v12, %v3685_v21  ;;  %v886_v2 = vpop.f32.mrb[23].mxu0 }
 0x31c   :  { %v950_v50 = vmul.f32 0.70710677, %v884_v48  ;;  %v887_v6 = vadd.f32 %v3685_v21, %v886_v2 }
 0x31d   :  { %3044 = verf.f32 %v952_v19  ;;  %v953_v31 = vmul.f32 0.70710677, %v895_v0 }
 0x31e   :  { %3046 = verf.f32 %v950_v50  ;;  %v951_v51 = vmul.f32 0.70710677, %v887_v6 }
 0x31f   :  { %v3037_v52 = vpop.eup %3036  ;;  %3048 = verf.f32 %v953_v31 }
 0x320   :  { %v3039_v4 = vpop.eup %3038  ;;  %v980_v5 = vadd.f32 1.0, %v3037_v52  ;;  %3050 = verf.f32 %v951_v51  ;;  %v2790_v9 = vpop.f32.mrb[24].mxu0 }
 0x321   :  { %v3041_v13 = vpop.eup %3040  ;;  %v978_v14 = vadd.f32 1.0, %v3039_v4  ;;  %v3696_v15 = vadd.f32 %v2790_v9, %v3685_v21  ;;  %v899_v22 = vpop.f32.mrb[25].mxu0 }
 0x322   :  { %v3043_v28 = vpop.eup %3042  ;;  %v981_v34 = vadd.f32 1.0, %v3041_v13  ;;  %v3699_v35 = vadd.f32 %v3685_v21, %v899_v22  ;;  %v2791_v37 = vpop.f32.mrb[26].mxu0  ;;  %v996_v2 = vmul.f32 %v980_v5, %v932_v30 }
 0x323   :  { %v979_v47 = vadd.f32 1.0, %v3043_v28  ;;  %v956_v12 = vmul.f32 0.70710677, %v3696_v15  ;;  %v902_v19 = vpop.f32.mrb[27].mxu0  ;;  %v911_v51 = vadd.f32 %v2791_v37, %v3685_v21  ;;  %v994_v52 = vmul.f32 %v978_v14, %v930_v38 }
 0x324   :  { %v997_v50 = vmul.f32 %v981_v34, %v933_v32  ;;  %v954_v31 = vmul.f32 0.70710677, %v3699_v35  ;;  %v903_v33 = vadd.f32 %v3685_v21, %v902_v19  ;;  %v936_v38 = vmul.f32 0.5, %v892_v46 }
 0x325   :  { %v995_v27 = vmul.f32 %v979_v47, %v931_v41  ;;  %3052 = verf.f32 %v956_v12  ;;  %v957_v9 = vmul.f32 0.70710677, %v911_v51  ;;  %v937_v41 = vmul.f32 0.5, %v895_v0 }
 0x326   :  { %v1011_v4 = vpack.c.bf16 %v997_v50, %v996_v2  ;;  %3054 = verf.f32 %v954_v31  ;;  %v955_v36 = vmul.f32 0.70710677, %v903_v33  ;;  %v934_v2 = vmul.f32 0.5, %v884_v48 }
 0x327   :  { %v3045_v29 = vpop.eup %3044  ;;  %v1010_v13 = vpack.c.bf16 %v995_v27, %v994_v52  ;;  %3056 = verf.f32 %v957_v9  ;;  %v935_v50 = vmul.f32 0.5, %v887_v6 }
 0x328   :  { %v3047_v22 = vpop.eup %3046  ;;  %v984_v28 = vadd.f32 1.0, %v3045_v29  ;;  %v2794_v5 = vpop.f32.mrb[28].mxu0  ;;  %3058 = verf.f32 %v955_v36 }
 0x329   :  { %v3049_v30 = vpop.eup %3048  ;;  %v982_v32 = vadd.f32 1.0, %v3047_v22  ;;  %v924_v34 = vadd.f32 %v2794_v5, %v3685_v21  ;;  %v915_v14 = vpop.f32.mrb[29].mxu0  ;;  %2812 = vmatprep.mubr.bf16.mxu1 %v1010_v13 }
 0x32a   :  { %v3051_v37 = vpop.eup %3050  ;;  %v985_v47 = vadd.f32 1.0, %v3049_v30  ;;  %v916_v12 = vadd.f32 %v3685_v21, %v915_v14  ;;  %v2795_v19 = vpop.f32.mrb[30].mxu0  ;;  %2813 = vmatmul.mubr.bf16.vlgmr.msra.gmra.mrb[16].mxu1 %v1011_v4  ;;  %v1000_v9 = vmul.f32 %v984_v28, %v936_v38 }
 0x32b   :  { %v983_v31 = vadd.f32 1.0, %v3051_v37  ;;  %v960_v52 = vmul.f32 0.70710677, %v924_v34  ;;  %v918_v27 = vpop.f32.mrb[31].mxu0  ;;  %v927_v22 = vadd.f32 %v2795_v19, %v3685_v21  ;;  %v998_v5 = vmul.f32 %v982_v32, %v934_v2 }
 0x32c   :  { %v1001_v29 = vmul.f32 %v985_v47, %v937_v41  ;;  %v958_v36 = vmul.f32 0.70710677, %v916_v12  ;;  %v919_v46 = vadd.f32 %v3685_v21, %v918_v27  ;;  %v940_v32 = vmul.f32 0.5, %v3696_v15 }
 0x32d   :  { %v999_v13 = vmul.f32 %v983_v31, %v935_v50  ;;  %3060 = verf.f32 %v960_v52  ;;  %v961_v0 = vmul.f32 0.70710677, %v927_v22  ;;  %v941_v47 = vmul.f32 0.5, %v911_v51 }
 0x32e   :  { %3062 = verf.f32 %v958_v36  ;;  %v1013_v30 = vpack.c.bf16 %v1001_v29, %v1000_v9  ;;  %v959_v4 = vmul.f32 0.70710677, %v919_v46  ;;  %v938_v21 = vmul.f32 0.5, %v3699_v35 }
 0x32f   :  { %v3053_v14 = vpop.eup %3052  ;;  %v1012_v48 = vpack.c.bf16 %v999_v13, %v998_v5  ;;  %3064 = verf.f32 %v961_v0  ;;  %v939_v2 = vmul.f32 0.5, %v903_v33  ;;  %v944_v15 = vmul.f32 0.5, %v924_v34  ;;  %v3714_v34 = vld [vmem:[%s4448_s2 + $0x2] ss:$0 sm:$0xff] }
 0x330   :  { %v3055_v6 = vpop.eup %3054  ;;  %v988_v37 = vadd.f32 1.0, %v3053_v14  ;;  %3066 = verf.f32 %v959_v4  ;;  %v945_v51 = vmul.f32 0.5, %v927_v22  ;;  %v942_v35 = vmul.f32 0.5, %v916_v12 }
 0x331   :  { %2816 = vmatprep.mubr.bf16.mxu1 %v1012_v48  ;;  %v3057_v28 = vpop.eup %3056  ;;  %v986_v38 = vadd.f32 1.0, %v3055_v6  ;;  %v943_v33 = vmul.f32 0.5, %v919_v46 }
 0x332   :  { %2817 = vmatmul.mubr.bf16.gmra.mrb[20].mxu1 %v1013_v30  ;;  %v3059_v41 = vpop.eup %3058  ;;  %v989_v19 = vadd.f32 1.0, %v3057_v28  ;;  %v1004_v31 = vmul.f32 %v988_v37, %v940_v32 }
 0x333   :  { %v987_v50 = vadd.f32 1.0, %v3059_v41  ;;  %v1002_v27 = vmul.f32 %v986_v38, %v938_v21 }
 0x334   :  { %v1005_v52 = vmul.f32 %v989_v19, %v941_v47  ;;  %v2958_v19 = vld [vmem:[#allocation2 + $0x60] sm:$0xff]  }
 0x335   :  { %v1003_v9 = vmul.f32 %v987_v50, %v939_v2  ;;  %2828 = vmatprep.subr.bf16.mxu0 %v2958_v19 }
 0x336   :  { %v1015_v36 = vpack.c.bf16 %v1005_v52, %v1004_v31  ;;  %2829 = vmatpush3.bf16.msra.mxu0 %v2958_v19 }
 0x337   :  { %v3061_v29 = vpop.eup %3060  ;;  %v1014_v13 = vpack.c.bf16 %v1003_v9, %v1002_v27 }
 0x338   :  { %v3063_v5 = vpop.eup %3062  ;;  %v992_v0 = vadd.f32 1.0, %v3061_v29 }
 0x339   :  { %v3065_v14 = vpop.eup %3064  ;;  %v990_v30 = vadd.f32 1.0, %v3063_v5  ;;  %2820 = vmatprep.mubr.bf16.mxu1 %v1014_v13 }
 0x33a   :  { %v3067_v4 = vpop.eup %3066  ;;  %v993_v48 = vadd.f32 1.0, %v3065_v14  ;;  %2821 = vmatmul.mubr.bf16.gmra.mrb[24].mxu1 %v1015_v36  ;;  %v1008_v37 = vmul.f32 %v992_v0, %v944_v15 }
 0x33b   :  { %v991_v6 = vadd.f32 1.0, %v3067_v4  ;;  %v1006_v38 = vmul.f32 %v990_v30, %v942_v35 }
 0x33c   :  { %v1009_v28 = vmul.f32 %v993_v48, %v945_v51 }
 0x33d   :  { %v1007_v41 = vmul.f32 %v991_v6, %v943_v33 }
 0x33e   :  { %v1017_v32 = vpack.c.bf16 %v1009_v28, %v1008_v37 }
 0x33f   :  { %v1016_v47 = vpack.c.bf16 %v1007_v41, %v1006_v38 }
 0x341   :  { %2824 = vmatprep.mubr.bf16.mxu1 %v1016_v47 }
 0x342   :  { %2825 = vmatmul.mubr.bf16.gmra.mrb[28].mxu1 %v1017_v32 }
 0x3fd   :  { %v2814_v22 = vpop.f32.mrb[16].mxu1 }
 0x3fe   :  { %v1130_v12 = vadd.f32 %v2814_v22, %v3714_v34  ;;  %v1121_v46 = vpop.f32.mrb[17].mxu1 }
 0x3ff   :  { %v1122_v21 = vadd.f32 %v3714_v34, %v1121_v46  ;;  %v2815_v2 = vpop.f32.mrb[18].mxu1 }
 0x400   :  { %v1133_v50 = vadd.f32 %v2815_v2, %v3714_v34  ;;  %v1124_v31 = vpop.f32.mrb[19].mxu1  ;;  %v3720_v52 = vadd.f32 %v1130_v12, %v3506_v39 }
 0x401   :  { %v3723_v27 = vadd.f32 %v1122_v21, %v3509_v40  ;;  %v1125_v9 = vadd.f32 %v3714_v34, %v1124_v31 }
 0x402   :  { %v3727_v29 = vadd.f32 %v1133_v50, %v3513_v44  ;;  %v1314_v40 = vmul.f32 %v3720_v52, %v3720_v52 }
 0x403   :  { %v3730_v36 = vadd.f32 %v1125_v9, %v3516_v45  ;;  %v1312_v5 = vmul.f32 %v3723_v27, %v3723_v27 }
 0x404   :  { %v1315_v15 = vmul.f32 %v3727_v29, %v3727_v29  ;;  %v1334_v37 = vsel %vm70_vm0, %v1314_v40, 0.0 }
 0x405   :  { %v2818_v13 = vpop.f32.mrb[20].mxu1  ;;  %v1328_v0 = vsel %vm70_vm0, %v1312_v5, 0.0  ;;  %v1313_v39 = vmul.f32 %v3730_v36, %v3730_v36 }
 0x406   :  { %v1146_v14 = vadd.f32 %v2818_v13, %v3714_v34  ;;  %v1137_v30 = vpop.f32.mrb[21].mxu1  ;;  %1329 = vadd.xlane.f32.xlu0 %v1328_v0  ;;  %v1337_v41 = vsel %vm70_vm0, %v1315_v15, 0.0 }
 0x407   :  { %v1138_v44 = vadd.f32 %v3714_v34, %v1137_v30  ;;  %v2819_v45 = vpop.f32.mrb[22].mxu1  ;;  %v1331_v4 = vsel %vm70_vm0, %v1313_v39, 0.0 }
 0x408   :  { %v1149_v51 = vadd.f32 %v2819_v45, %v3714_v34  ;;  %v1140_v48 = vpop.f32.mrb[23].mxu1  ;;  %1332 = vadd.xlane.f32.xlu1 %v1331_v4  ;;  %v3746_v35 = vadd.f32 %v1146_v14, %v3532_v55 }
 0x409   :  { %v3749_v33 = vadd.f32 %v1138_v44, %v3535_v56  ;;  %v1141_v6 = vadd.f32 %v3714_v34, %v1140_v48 }
 0x40a   :  { %1335 = vadd.xlane.f32.xlu0 %v1334_v37  ;;  %v3754_v28 = vadd.f32 %v1149_v51, %v3540_v59  ;;  %v1318_v47 = vmul.f32 %v3746_v35, %v3746_v35 }
 0x40b   :  { %v3757_v38 = vadd.f32 %v1141_v6, %v3543_v60  ;;  %v1316_v55 = vmul.f32 %v3749_v33, %v3749_v33 }
 0x40c   :  { %1338 = vadd.xlane.f32.xlu1 %v1337_v41  ;;  %v1319_v12 = vmul.f32 %v3754_v28, %v3754_v28  ;;  %v1346_v31 = vsel %vm70_vm0, %v1318_v47, 0.0 }
 0x40d   :  { %v1340_v56 = vsel %vm70_vm0, %v1316_v55, 0.0  ;;  %v1317_v32 = vmul.f32 %v3757_v38, %v3757_v38  ;;  %v2822_v19 = vpop.f32.mrb[24].mxu1 }
 0x40e   :  { %1341 = vadd.xlane.f32.xlu0 %v1340_v56  ;;  %v1162_v59 = vadd.f32 %v2822_v19, %v3714_v34  ;;  %v1153_v60 = vpop.f32.mrb[25].mxu1  ;;  %v1349_v0 = vsel %vm70_vm0, %v1319_v12, 0.0  ;;  %v2959_v12 = vld [vmem:[#allocation2 + $0x68] sm:$0xff]  }
 0x40f   :  { %v1343_v22 = vsel %vm70_vm0, %v1317_v32, 0.0  ;;  %v1154_v46 = vadd.f32 %v3714_v34, %v1153_v60  ;;  %v2823_v21 = vpop.f32.mrb[26].mxu1  ;;  %2830 = vmatprep.subr.bf16.mxu0 %v2959_v12 }
 0x410   :  { %1344 = vadd.xlane.f32.xlu1 %v1343_v22  ;;  %v1165_v2 = vadd.f32 %v2823_v21, %v3714_v34  ;;  %v1156_v50 = vpop.f32.mrb[27].mxu1  ;;  %v3775_v9 = vadd.f32 %v1162_v59, %v3560_v16  ;;  %2831 = vmatpush3.bf16.msra.mxu0 %v2959_v12 }
 0x411   :  { %v3778_v5 = vadd.f32 %v1154_v46, %v3563_v20  ;;  %v1157_v13 = vadd.f32 %v3714_v34, %v1156_v50 }
 0x412   :  { %1347 = vadd.xlane.f32.xlu0 %v1346_v31  ;;  %v3783_v39 = vadd.f32 %v1165_v2, %v3568_v25  ;;  %v1322_v44 = vmul.f32 %v3775_v9, %v3775_v9 }
 0x413   :  { %v3786_v40 = vadd.f32 %v1157_v13, %v3571_v26  ;;  %v1320_v14 = vmul.f32 %v3778_v5, %v3778_v5 }
 0x414   :  { %1350 = vadd.xlane.f32.xlu1 %v1349_v0  ;;  %v1323_v51 = vmul.f32 %v3783_v39, %v3783_v39  ;;  %v1358_v56 = vsel %vm70_vm0, %v1322_v44, 0.0 }
 0x415   :  { %4463 = vst [vmem:[#allocation8_spill] sm:$0xff] %v3786_v40  ;;  %v2826_v16 = vpop.f32.mrb[28].mxu1  ;;  %v1352_v30 = vsel %vm70_vm0, %v1320_v14, 0.0  ;;  %v1321_v20 = vmul.f32 %v3786_v40, %v3786_v40 }
 0x416   :  { %v1178_v45 = vadd.f32 %v2826_v16, %v3714_v34  ;;  %v1169_v25 = vpop.f32.mrb[29].mxu1  ;;  %1353 = vadd.xlane.f32.xlu0 %v1352_v30  ;;  %v1361_v19 = vsel %vm70_vm0, %v1323_v51, 0.0 }
 0x417   :  { %v1170_v26 = vadd.f32 %v3714_v34, %v1169_v25  ;;  %v2827_v4 = vpop.f32.mrb[30].mxu1  ;;  %v1355_v15 = vsel %vm70_vm0, %v1321_v20, 0.0 }
 0x418   :  { %v1181_v48 = vadd.f32 %v2827_v4, %v3714_v34  ;;  %v1172_v6 = vpop.f32.mrb[31].mxu1  ;;  %1356 = vadd.xlane.f32.xlu1 %v1355_v15  ;;  %v3802_v37 = vadd.f32 %v1178_v45, %v3594_v17 }
 0x419   :  { %v3805_v41 = vadd.f32 %v1170_v26, %v3597_v18  ;;  %v1173_v55 = vadd.f32 %v3714_v34, %v1172_v6 }
 0x41a   :  { %4464 = vst [vmem:[#allocation9_spill] sm:$0xff] %v3802_v37  ;;  %1359 = vadd.xlane.f32.xlu0 %v1358_v56  ;;  %v3810_v32 = vadd.f32 %v1181_v48, %v3602_v1  ;;  %v1326_v59 = vmul.f32 %v3802_v37, %v3802_v37 }
 0x41b   :  { %4465 = vst [vmem:[#allocation10_spill] sm:$0xff] %v3805_v41  ;;  %v3813_v47 = vadd.f32 %v1173_v55, %v3605_v49  ;;  %v1324_v17 = vmul.f32 %v3805_v41, %v3805_v41 }
 0x41c   :  { %4466 = vst [vmem:[#allocation11_spill] sm:$0xff] %v3810_v32  ;;  %1362 = vadd.xlane.f32.xlu1 %v1361_v19  ;;  %v1327_v49 = vmul.f32 %v3810_v32, %v3810_v32  ;;  %v1370_v60 = vsel %vm70_vm0, %v1326_v59, 0.0 }
 0x41d   :  { %4467 = vst [vmem:[#allocation12_spill] sm:$0xff] %v3813_v47  ;;  %v1364_v18 = vsel %vm70_vm0, %v1324_v17, 0.0  ;;  %v1325_v34 = vmul.f32 %v3813_v47, %v3813_v47 }
 0x41e   :  { %1365 = vadd.xlane.f32.xlu0 %v1364_v18  ;;  %v1373_v22 = vsel %vm70_vm0, %v1327_v49, 0.0 }
 0x41f   :  { %v1367_v1 = vsel %vm70_vm0, %v1325_v34, 0.0 }
 0x420   :  { %1368 = vadd.xlane.f32.xlu1 %v1367_v1 }
 0x422   :  { %1371 = vadd.xlane.f32.xlu0 %v1370_v60 }
 0x424   :  { %1374 = vadd.xlane.f32.xlu1 %v1373_v22 }
 0x493   :  { %v1330_v46 = vpop.xlane.xlu0 %1329 }
 0x494   :  { %v1376_v21 = vadd.f32 1e-06, %v1330_v46 }
 0x495   :  { %v1333_v2 = vpop.xlane.xlu1 %1332 }
 0x496   :  { %3068 = vrsqrt.f32 %v1376_v21  ;;  %v1377_v50 = vadd.f32 1e-06, %v1333_v2 }
 0x497   :  { %v1336_v31 = vpop.xlane.xlu0 %1335 }
 0x498   :  { %3070 = vrsqrt.f32 %v1377_v50  ;;  %v1378_v13 = vadd.f32 1e-06, %v1336_v31 }
 0x499   :  { %v1339_v0 = vpop.xlane.xlu1 %1338 }
 0x49a   :  { %3072 = vrsqrt.f32 %v1378_v13  ;;  %v1379_v14 = vadd.f32 1e-06, %v1339_v0 }
 0x49b   :  { %v1342_v16 = vpop.xlane.xlu0 %1341 }
 0x49c   :  { %3074 = vrsqrt.f32 %v1379_v14  ;;  %v1380_v30 = vadd.f32 1e-06, %v1342_v16 }
 0x49d   :  { %v1345_v20 = vpop.xlane.xlu1 %1344 }
 0x49e   :  { %3076 = vrsqrt.f32 %v1380_v30  ;;  %v1381_v44 = vadd.f32 1e-06, %v1345_v20 }
 0x49f   :  { %v1348_v45 = vpop.xlane.xlu0 %1347 }
 0x4a0   :  { %v3069_v25 = vpop.eup %3068  ;;  %3078 = vrsqrt.f32 %v1381_v44  ;;  %v1382_v26 = vadd.f32 1e-06, %v1348_v45 }
 0x4a1   :  { %v1351_v4 = vpop.xlane.xlu1 %1350  ;;  %v1408_v48 = vmul.f32 %v3069_v25, %v3723_v27 }
 0x4a2   :  { %v3071_v15 = vpop.eup %3070  ;;  %3080 = vrsqrt.f32 %v1382_v26  ;;  %v1383_v51 = vadd.f32 1e-06, %v1351_v4 }
 0x4a3   :  { %v1409_v6 = vmul.f32 %v3071_v15, %v3730_v36  ;;  %v1354_v56 = vpop.xlane.xlu0 %1353 }
 0x4a4   :  { %v3073_v55 = vpop.eup %3072  ;;  %3082 = vrsqrt.f32 %v1383_v51  ;;  %v1384_v19 = vadd.f32 1e-06, %v1354_v56 }
 0x4a5   :  { %v1424_v17 = vpack.c.bf16 %v1409_v6, %v1408_v48  ;;  %v1357_v34 = vpop.xlane.xlu1 %1356  ;;  %v1410_v59 = vmul.f32 %v3073_v55, %v3720_v52 }
 0x4a6   :  { %v3075_v18 = vpop.eup %3074  ;;  %3084 = vrsqrt.f32 %v1384_v19  ;;  %v1385_v49 = vadd.f32 1e-06, %v1357_v34 }
 0x4a7   :  { %v1411_v1 = vmul.f32 %v3075_v18, %v3727_v29  ;;  %2832 = vmatprep.mubr.msk.bf16.mxu0 %vm70_vm0, %v1424_v17  ;;  %v1360_v22 = vpop.xlane.xlu0 %1359 }
 0x4a8   :  { %v3077_v60 = vpop.eup %3076  ;;  %3086 = vrsqrt.f32 %v1385_v49  ;;  %v1386_v46 = vadd.f32 1e-06, %v1360_v22 }
 0x4a9   :  { %v1425_v12 = vpack.c.bf16 %v1411_v1, %v1410_v59  ;;  %v1363_v2 = vpop.xlane.xlu1 %1362  ;;  %v1412_v31 = vmul.f32 %v3077_v60, %v3749_v33 }
 0x4aa   :  { %v3079_v21 = vpop.eup %3078  ;;  %3088 = vrsqrt.f32 %v1386_v46  ;;  %v1387_v50 = vadd.f32 1e-06, %v1363_v2 }
 0x4ab   :  { %2833 = vmatmul.mubr.msk.bf16.vlgmr.msra.gmra.mrb[32].mxu0 %vm70_vm0, %v1425_v12  ;;  %v1413_v13 = vmul.f32 %v3079_v21, %v3757_v38  ;;  %v1366_v14 = vpop.xlane.xlu0 %1365 }
 0x4ac   :  { %v3081_v0 = vpop.eup %3080  ;;  %3090 = vrsqrt.f32 %v1387_v50  ;;  %v1388_v16 = vadd.f32 1e-06, %v1366_v14 }
 0x4ad   :  { %v1426_v30 = vpack.c.bf16 %v1413_v13, %v1412_v31  ;;  %v1369_v44 = vpop.xlane.xlu1 %1368  ;;  %v1414_v25 = vmul.f32 %v3081_v0, %v3746_v35 }
 0x4ae   :  { %v3083_v20 = vpop.eup %3082  ;;  %3092 = vrsqrt.f32 %v1388_v16  ;;  %v1389_v45 = vadd.f32 1e-06, %v1369_v44  ;;  %v2960_v16 = vld [vmem:[#allocation2 + $0x70] sm:$0xff]  }
 0x4af   :  { %2836 = vmatprep.mubr.msk.bf16.mxu0 %vm70_vm0, %v1426_v30  ;;  %v1415_v26 = vmul.f32 %v3083_v20, %v3754_v28  ;;  %v1372_v4 = vpop.xlane.xlu0 %1371  ;;  %2848 = vmatprep.subr.bf16.mxu1 %v2960_v16  ;;  %v3855_v30 = vld [vmem:[%s4448_s2 + $0x3] ss:$0 sm:$0xff] }
 0x4b0   :  { %v3085_v15 = vpop.eup %3084  ;;  %3094 = vrsqrt.f32 %v1389_v45  ;;  %v1390_v51 = vadd.f32 1e-06, %v1372_v4  ;;  %2849 = vmatpush3.bf16.msra.mxu1 %v2960_v16 }
 0x4b1   :  { %v1427_v48 = vpack.c.bf16 %v1415_v26, %v1414_v25  ;;  %v1375_v6 = vpop.xlane.xlu1 %1374  ;;  %v1416_v19 = vmul.f32 %v3085_v15, %v3778_v5 }
 0x4b2   :  { %v3087_v55 = vpop.eup %3086  ;;  %3096 = vrsqrt.f32 %v1390_v51  ;;  %v1391_v56 = vadd.f32 1e-06, %v1375_v6 }
 0x4b3   :  { %2837 = vmatmul.mubr.msk.bf16.gmra.mrb[36].mxu0 %vm70_vm0, %v1427_v48  ;;  %v1417_v17 = vmul.f32 %v3087_v55, %v3786_v40 }
 0x4b4   :  { %v3089_v18 = vpop.eup %3088  ;;  %3098 = vrsqrt.f32 %v1391_v56 }
 0x4b5   :  { %v1428_v34 = vpack.c.bf16 %v1417_v17, %v1416_v19  ;;  %v1418_v1 = vmul.f32 %v3089_v18, %v3775_v9 }
 0x4b6   :  { %v3091_v59 = vpop.eup %3090 }
 0x4b7   :  { %2840 = vmatprep.mubr.msk.bf16.mxu0 %vm70_vm0, %v1428_v34  ;;  %v1419_v49 = vmul.f32 %v3091_v59, %v3783_v39 }
 0x4b8   :  { %v3093_v60 = vpop.eup %3092 }
 0x4b9   :  { %v1429_v22 = vpack.c.bf16 %v1419_v49, %v1418_v1  ;;  %v1420_v46 = vmul.f32 %v3093_v60, %v3805_v41 }
 0x4ba   :  { %v3095_v12 = vpop.eup %3094 }
 0x4bb   :  { %2841 = vmatmul.mubr.msk.bf16.gmra.mrb[40].mxu0 %vm70_vm0, %v1429_v22  ;;  %v1421_v21 = vmul.f32 %v3095_v12, %v3813_v47 }
 0x4bc   :  { %v3097_v2 = vpop.eup %3096 }
 0x4bd   :  { %v1430_v50 = vpack.c.bf16 %v1421_v21, %v1420_v46  ;;  %v1422_v13 = vmul.f32 %v3097_v2, %v3802_v37 }
 0x4be   :  { %v3099_v31 = vpop.eup %3098 }
 0x4bf   :  { %2844 = vmatprep.mubr.msk.bf16.mxu0 %vm70_vm0, %v1430_v50  ;;  %v1423_v0 = vmul.f32 %v3099_v31, %v3810_v32 }
 0x4c1   :  { %v1431_v14 = vpack.c.bf16 %v1423_v0, %v1422_v13 }
 0x4c3   :  { %2845 = vmatmul.mubr.msk.bf16.gmra.mrb[44].mxu0 %vm70_vm0, %v1431_v14 }
 0x57e   :  { %v2834_v20 = vpop.f32.mrb[32].mxu0 }
 0x57f   :  { %v1520_v44 = vadd.f32 %v2834_v20, %v3855_v30  ;;  %v1511_v45 = vpop.f32.mrb[33].mxu0 }
 0x580   :  { %v1512_v25 = vadd.f32 %v3855_v30, %v1511_v45  ;;  %v2835_v26 = vpop.f32.mrb[34].mxu0 }
 0x581   :  { %v1523_v4 = vadd.f32 %v2835_v26, %v3855_v30  ;;  %v1514_v15 = vpop.f32.mrb[35].mxu0  ;;  %v3861_v51 = vadd.f32 %v1520_v44, %v3720_v52 }
 0x582   :  { %v3864_v48 = vadd.f32 %v1512_v25, %v3723_v27  ;;  %v1515_v6 = vadd.f32 %v3855_v30, %v1514_v15 }
 0x583   :  { %v3868_v55 = vadd.f32 %v1523_v4, %v3727_v29  ;;  %v1592_v59 = vmul.f32 %v3861_v51, %v3861_v51 }
 0x584   :  { %v3871_v56 = vadd.f32 %v1515_v6, %v3730_v36  ;;  %v1590_v19 = vmul.f32 %v3864_v48, %v3864_v48 }
 0x585   :  { %v1593_v46 = vmul.f32 %v3868_v55, %v3868_v55  ;;  %v1612_v0 = vsel %vm70_vm0, %v1592_v59, 0.0 }
 0x586   :  { %v2838_v17 = vpop.f32.mrb[36].mxu0  ;;  %v1606_v18 = vsel %vm70_vm0, %v1590_v19, 0.0  ;;  %v1591_v34 = vmul.f32 %v3871_v56, %v3871_v56 }
 0x587   :  { %v1536_v1 = vadd.f32 %v2838_v17, %v3855_v30  ;;  %1607 = vadd.xlane.f32.xlu0 %v1606_v18  ;;  %v1527_v49 = vpop.f32.mrb[37].mxu0  ;;  %v1615_v20 = vsel %vm70_vm0, %v1593_v46, 0.0 }
 0x588   :  { %v1528_v60 = vadd.f32 %v3855_v30, %v1527_v49  ;;  %v2839_v22 = vpop.f32.mrb[38].mxu0  ;;  %v1609_v12 = vsel %vm70_vm0, %v1591_v34, 0.0 }
 0x589   :  { %v1539_v21 = vadd.f32 %v2839_v22, %v3855_v30  ;;  %1610 = vadd.xlane.f32.xlu1 %v1609_v12  ;;  %v1530_v2 = vpop.f32.mrb[39].mxu0  ;;  %v3887_v50 = vadd.f32 %v1536_v1, %v3746_v35 }
 0x58a   :  { %v3890_v31 = vadd.f32 %v1528_v60, %v3749_v33  ;;  %v1531_v13 = vadd.f32 %v3855_v30, %v1530_v2 }
 0x58b   :  { %1613 = vadd.xlane.f32.xlu0 %v1612_v0  ;;  %v3895_v14 = vadd.f32 %v1539_v21, %v3754_v28  ;;  %v1596_v26 = vmul.f32 %v3887_v50, %v3887_v50 }
 0x58c   :  { %v3898_v16 = vadd.f32 %v1531_v13, %v3757_v38  ;;  %v1594_v44 = vmul.f32 %v3890_v31, %v3890_v31 }
 0x58d   :  { %1616 = vadd.xlane.f32.xlu1 %v1615_v20  ;;  %v1597_v17 = vmul.f32 %v3895_v14, %v3895_v14  ;;  %v1624_v49 = vsel %vm70_vm0, %v1596_v26, 0.0 }
 0x58e   :  { %v1618_v45 = vsel %vm70_vm0, %v1594_v44, 0.0  ;;  %v1595_v25 = vmul.f32 %v3898_v16, %v3898_v16  ;;  %v2842_v4 = vpop.f32.mrb[40].mxu0 }
 0x58f   :  { %1619 = vadd.xlane.f32.xlu0 %v1618_v45  ;;  %v1552_v15 = vadd.f32 %v2842_v4, %v3855_v30  ;;  %v1543_v6 = vpop.f32.mrb[41].mxu0  ;;  %v1627_v46 = vsel %vm70_vm0, %v1597_v17, 0.0 }
 0x590   :  { %v1621_v19 = vsel %vm70_vm0, %v1595_v25, 0.0  ;;  %v1544_v18 = vadd.f32 %v3855_v30, %v1543_v6  ;;  %v2843_v34 = vpop.f32.mrb[42].mxu0 }
 0x591   :  { %1622 = vadd.xlane.f32.xlu1 %v1621_v19  ;;  %v1555_v59 = vadd.f32 %v2843_v34, %v3855_v30  ;;  %v1546_v1 = vpop.f32.mrb[43].mxu0  ;;  %v3916_v60 = vadd.f32 %v1552_v15, %v3775_v9 }
 0x592   :  { %v3919_v22 = vadd.f32 %v1544_v18, %v3778_v5  ;;  %v1547_v12 = vadd.f32 %v3855_v30, %v1546_v1 }
 0x593   :  { %1625 = vadd.xlane.f32.xlu0 %v1624_v49  ;;  %v3924_v21 = vadd.f32 %v1555_v59, %v3783_v39  ;;  %v1600_v45 = vmul.f32 %v3916_v60, %v3916_v60 }
 0x594   :  { %v3927_v2 = vadd.f32 %v1547_v12, %v3786_v40  ;;  %v1598_v13 = vmul.f32 %v3919_v22, %v3919_v22 }
 0x595   :  { %1628 = vadd.xlane.f32.xlu1 %v1627_v46  ;;  %v1601_v19 = vmul.f32 %v3924_v21, %v3924_v21  ;;  %v1636_v49 = vsel %vm70_vm0, %v1600_v45, 0.0  ;;  %v2491_v45 = vld [vmem:[%s4448_s2 + $0x7] ss:$0 sm:$0xff] }
 0x596   :  { %v2846_v0 = vpop.f32.mrb[44].mxu0  ;;  %v1630_v20 = vsel %vm70_vm0, %v1598_v13, 0.0  ;;  %v1599_v44 = vmul.f32 %v3927_v2, %v3927_v2 }
 0x597   :  { %v1568_v25 = vadd.f32 %v2846_v0, %v3855_v30  ;;  %1631 = vadd.xlane.f32.xlu0 %v1630_v20  ;;  %v1559_v26 = vpop.f32.mrb[45].mxu0  ;;  %v1639_v13 = vsel %vm70_vm0, %v1601_v19, 0.0 }
 0x598   :  { %v1560_v4 = vadd.f32 %v3855_v30, %v1559_v26  ;;  %v2847_v15 = vpop.f32.mrb[46].mxu0  ;;  %v1633_v6 = vsel %vm70_vm0, %v1599_v44, 0.0 }
 0x599   :  { %v1571_v17 = vadd.f32 %v2847_v15, %v3855_v30  ;;  %1634 = vadd.xlane.f32.xlu1 %v1633_v6  ;;  %v1562_v18 = vpop.f32.mrb[47].mxu0  ;;  %v3943_v34 = vadd.f32 %v1568_v25, %v3802_v37  ;;  %v3975_v6 = vadd.f32 %v2491_v45, %v3632_v8  ;;  %v3989_v8 = vadd.f32 %v2491_v45, %v3636_v3 }
 0x59a   :  { %v3946_v59 = vadd.f32 %v1560_v4, %v3805_v41  ;;  %v1563_v1 = vadd.f32 %v3855_v30, %v1562_v18  ;;  %v3971_v4 = vadd.f32 %v2491_v45, %v3628_v11  ;;  %v3984_v11 = vadd.f32 %v3630_v62, %v2491_v45 }
 0x59b   :  { %4468 = vst [vmem:[#allocation13_spill] sm:$0xff] %v3943_v34  ;;  %1637 = vadd.xlane.f32.xlu0 %v1636_v49  ;;  %v3951_v12 = vadd.f32 %v1571_v17, %v3810_v32  ;;  %v1604_v44 = vmul.f32 %v3943_v34, %v3943_v34  ;;  %v3979_v17 = vadd.f32 %v3626_v43, %v2491_v45  ;;  %v217_v49 = vsel %vm213_vm1, %v3975_v6, -inf }
 0x59c   :  { %4469 = vst [vmem:[#allocation14_spill] sm:$0xff] %v3946_v59  ;;  %v3954_v46 = vadd.f32 %v1563_v1, %v3813_v47  ;;  %v1602_v0 = vmul.f32 %v3946_v59, %v3946_v59  ;;  %v214_v18 = vsel %vm213_vm1, %v3971_v4, -inf  ;;  %v2961_v1 = vld [vmem:[#allocation2 + $0x78] sm:$0xff]   ;;  %v223_v62 = vsel %vm213_vm1, %v3984_v11, -inf }
 0x59d   :  { %4470 = vst [vmem:[#allocation15_spill] sm:$0xff] %v3951_v12  ;;  %1640 = vadd.xlane.f32.xlu1 %v1639_v13  ;;  %v1605_v26 = vmul.f32 %v3951_v12, %v3951_v12  ;;  %v1648_v15 = vsel %vm70_vm0, %v1604_v44, 0.0  ;;  %2850 = vmatprep.subr.bf16.mxu1 %v2961_v1  ;;  %v220_v43 = vsel %vm213_vm1, %v3979_v17, -inf  ;;  %v3994_v13 = vadd.f32 %v2491_v45, %v3640_v7 }
 0x59e   :  { %4471 = vst [vmem:[#allocation16_spill] sm:$0xff] %v3954_v46  ;;  %v1642_v20 = vsel %vm70_vm0, %v1602_v0, 0.0  ;;  %v1603_v30 = vmul.f32 %v3954_v46, %v3954_v46  ;;  %2851 = vmatpush3.bf16.msra.mxu1 %v2961_v1  ;;  %v3999_v0 = vadd.f32 %v3634_v63, %v2491_v45  ;;  %v4004_v3 = vadd.f32 %v3638_v10, %v2491_v45 }
 0x59f   :  { %1643 = vadd.xlane.f32.xlu0 %v1642_v20  ;;  %v1651_v19 = vsel %vm70_vm0, %v1605_v26, 0.0  ;;  %v226_v20 = vsel %vm213_vm1, %v3989_v8, -inf  ;;  %v4009_v7 = vadd.f32 %v2491_v45, %v3668_v54  ;;  %v4014_v63 = vadd.f32 %v2491_v45, %v3672_v58 }
 0x5a0   :  { %v1645_v25 = vsel %vm70_vm0, %v1603_v30, 0.0  ;;  %v229_v30 = vsel %vm213_vm1, %v3994_v13, -inf  ;;  %v232_v44 = vsel %vm213_vm1, %v3999_v0, -inf  ;;  %v4019_v10 = vadd.f32 %v3666_v53, %v2491_v45 }
 0x5a1   :  { %1646 = vadd.xlane.f32.xlu1 %v1645_v25  ;;  %v235_v25 = vsel %vm213_vm1, %v4004_v3, -inf  ;;  %v238_v26 = vsel %vm213_vm1, %v4009_v7, -inf  ;;  %v4024_v54 = vadd.f32 %v3670_v57, %v2491_v45  ;;  %v4029_v58 = vadd.f32 %v2491_v45, %v3676_v23 }
 0x5a2   :  { %v4034_v53 = vadd.f32 %v2491_v45, %v3680_v42  ;;  %v4039_v57 = vadd.f32 %v3674_v61, %v2491_v45  ;;  %v4044_v23 = vadd.f32 %v3678_v24, %v2491_v45 }
 0x5a3   :  { %1649 = vadd.xlane.f32.xlu0 %v1648_v15  ;;  %v241_v15 = vsel %vm213_vm1, %v4014_v63, -inf  ;;  %v250_v1 = vsel %vm213_vm1, %v4029_v58, -inf }
 0x5a4   :  { %v256_v42 = vsel %vm213_vm1, %v4039_v57, -inf }
 0x5a5   :  { %1652 = vadd.xlane.f32.xlu1 %v1651_v19  ;;  %v244_v19 = vsel %vm213_vm1, %v4019_v10, -inf }
 0x5a7   :  { %215 = vmax.xlane.f32.xlu0 %v214_v18  ;;  %v247_v18 = vsel %vm213_vm1, %v4024_v54, -inf }
 0x5a9   :  { %218 = vmax.xlane.f32.xlu1 %v217_v49  ;;  %v253_v49 = vsel %vm213_vm1, %v4034_v53, -inf }
 0x5ab   :  { %221 = vmax.xlane.f32.xlu0 %v220_v43  ;;  %v259_v43 = vsel %vm213_vm1, %v4044_v23, -inf }
 0x5ad   :  { %224 = vmax.xlane.f32.xlu1 %v223_v62 }
 0x5af   :  { %227 = vmax.xlane.f32.xlu0 %v226_v20 }
 0x5b1   :  { %230 = vmax.xlane.f32.xlu1 %v229_v30 }
 0x5b3   :  { %233 = vmax.xlane.f32.xlu0 %v232_v44 }
 0x5b5   :  { %236 = vmax.xlane.f32.xlu1 %v235_v25 }
 0x5b7   :  { %239 = vmax.xlane.f32.xlu0 %v238_v26 }
 0x5b9   :  { %242 = vmax.xlane.f32.xlu1 %v241_v15 }
 0x5bb   :  { %245 = vmax.xlane.f32.xlu0 %v244_v19 }
 0x5bd   :  { %248 = vmax.xlane.f32.xlu1 %v247_v18 }
 0x5bf   :  { %251 = vmax.xlane.f32.xlu0 %v250_v1 }
 0x5c1   :  { %254 = vmax.xlane.f32.xlu1 %v253_v49 }
 0x5c3   :  { %257 = vmax.xlane.f32.xlu0 %v256_v42 }
 0x5c5   :  { %260 = vmax.xlane.f32.xlu1 %v259_v43 }
 0x614   :  { %v1608_v61 = vpop.xlane.xlu0 %1607 }
 0x615   :  { %v1654_v62 = vadd.f32 1e-06, %v1608_v61 }
 0x616   :  { %v1611_v20 = vpop.xlane.xlu1 %1610 }
 0x617   :  { %3100 = vrsqrt.f32 %v1654_v62  ;;  %v1655_v30 = vadd.f32 1e-06, %v1611_v20 }
 0x618   :  { %v1614_v44 = vpop.xlane.xlu0 %1613 }
 0x619   :  { %3102 = vrsqrt.f32 %v1655_v30  ;;  %v1656_v24 = vadd.f32 1e-06, %v1614_v44 }
 0x61a   :  { %v1617_v45 = vpop.xlane.xlu1 %1616 }
 0x61b   :  { %3104 = vrsqrt.f32 %v1656_v24  ;;  %v1657_v25 = vadd.f32 1e-06, %v1617_v45 }
 0x61c   :  { %v1620_v26 = vpop.xlane.xlu0 %1619 }
 0x61d   :  { %3106 = vrsqrt.f32 %v1657_v25  ;;  %v1658_v15 = vadd.f32 1e-06, %v1620_v26 }
 0x61e   :  { %v1623_v19 = vpop.xlane.xlu1 %1622 }
 0x61f   :  { %3108 = vrsqrt.f32 %v1658_v15  ;;  %v1659_v18 = vadd.f32 1e-06, %v1623_v19 }
 0x620   :  { %v1626_v1 = vpop.xlane.xlu0 %1625 }
 0x621   :  { %v3101_v49 = vpop.eup %3100  ;;  %3110 = vrsqrt.f32 %v1659_v18  ;;  %v1660_v42 = vadd.f32 1e-06, %v1626_v1 }
 0x622   :  { %v1629_v43 = vpop.xlane.xlu1 %1628  ;;  %v1686_v20 = vmul.f32 %v3101_v49, %v3864_v48 }
 0x623   :  { %v3103_v61 = vpop.eup %3102  ;;  %3112 = vrsqrt.f32 %v1660_v42  ;;  %v1661_v62 = vadd.f32 1e-06, %v1629_v43 }
 0x624   :  { %v1687_v30 = vmul.f32 %v3103_v61, %v3871_v56  ;;  %v1632_v24 = vpop.xlane.xlu0 %1631 }
 0x625   :  { %v3105_v44 = vpop.eup %3104  ;;  %3114 = vrsqrt.f32 %v1661_v62  ;;  %v1662_v45 = vadd.f32 1e-06, %v1632_v24 }
 0x626   :  { %v1702_v25 = vpack.c.bf16 %v1687_v30, %v1686_v20  ;;  %v1635_v15 = vpop.xlane.xlu1 %1634  ;;  %v1688_v19 = vmul.f32 %v3105_v44, %v3861_v51 }
 0x627   :  { %v3107_v26 = vpop.eup %3106  ;;  %3116 = vrsqrt.f32 %v1662_v45  ;;  %v1663_v1 = vadd.f32 1e-06, %v1635_v15 }
 0x628   :  { %v1689_v18 = vmul.f32 %v3107_v26, %v3868_v55  ;;  %2852 = vmatprep.mubr.msk.bf16.mxu1 %vm70_vm0, %v1702_v25  ;;  %v1638_v43 = vpop.xlane.xlu0 %1637 }
 0x629   :  { %v3109_v42 = vpop.eup %3108  ;;  %3118 = vrsqrt.f32 %v1663_v1  ;;  %v1664_v61 = vadd.f32 1e-06, %v1638_v43 }
 0x62a   :  { %v1703_v49 = vpack.c.bf16 %v1689_v18, %v1688_v19  ;;  %v1641_v62 = vpop.xlane.xlu1 %1640  ;;  %v1690_v20 = vmul.f32 %v3109_v42, %v3890_v31 }
 0x62b   :  { %v3111_v47 = vpop.eup %3110  ;;  %3120 = vrsqrt.f32 %v1664_v61  ;;  %v1665_v24 = vadd.f32 1e-06, %v1641_v62 }
 0x62c   :  { %2853 = vmatmul.mubr.msk.bf16.vlgmr.msra.gmra.mrb[32].mxu1 %vm70_vm0, %v1703_v49  ;;  %v1691_v30 = vmul.f32 %v3111_v47, %v3898_v16  ;;  %v1644_v45 = vpop.xlane.xlu0 %1643 }
 0x62d   :  { %v3113_v44 = vpop.eup %3112  ;;  %3122 = vrsqrt.f32 %v1665_v24  ;;  %v1666_v26 = vadd.f32 1e-06, %v1644_v45 }
 0x62e   :  { %v1704_v25 = vpack.c.bf16 %v1691_v30, %v1690_v20  ;;  %v1647_v32 = vpop.xlane.xlu1 %1646  ;;  %v1692_v18 = vmul.f32 %v3113_v44, %v3887_v50 }
 0x62f   :  { %v3115_v15 = vpop.eup %3114  ;;  %3124 = vrsqrt.f32 %v1666_v26  ;;  %v1667_v19 = vadd.f32 1e-06, %v1647_v32 }
 0x630   :  { %2856 = vmatprep.mubr.msk.bf16.mxu1 %vm70_vm0, %v1704_v25  ;;  %v1693_v1 = vmul.f32 %v3115_v15, %v3895_v14  ;;  %v1650_v43 = vpop.xlane.xlu0 %1649 }
 0x631   :  { %v3117_v49 = vpop.eup %3116  ;;  %3126 = vrsqrt.f32 %v1667_v19  ;;  %v1668_v42 = vadd.f32 1e-06, %v1650_v43 }
 0x632   :  { %v1705_v47 = vpack.c.bf16 %v1693_v1, %v1692_v18  ;;  %v1653_v61 = vpop.xlane.xlu1 %1652  ;;  %v1694_v32 = vmul.f32 %v3117_v49, %v3919_v22 }
 0x633   :  { %v3119_v62 = vpop.eup %3118  ;;  %3128 = vrsqrt.f32 %v1668_v42  ;;  %v1669_v24 = vadd.f32 1e-06, %v1653_v61 }
 0x634   :  { %2857 = vmatmul.mubr.msk.bf16.gmra.mrb[36].mxu1 %vm70_vm0, %v1705_v47  ;;  %v216_v20 = vpop.xlane.xlu0 %215  ;;  %v1695_v30 = vmul.f32 %v3119_v62, %v3927_v2 }
 0x635   :  { %v3121_v45 = vpop.eup %3120  ;;  %3130 = vrsqrt.f32 %v1669_v24  ;;  %v262_v44 = vsub.f32 %v3971_v4, %v216_v20 }
 0x636   :  { %v219_v26 = vpop.xlane.xlu1 %218  ;;  %v1706_v25 = vpack.c.bf16 %v1695_v30, %v1694_v32  ;;  %v1696_v43 = vmul.f32 %v3121_v45, %v3916_v60 }
 0x637   :  { %v3123_v15 = vpop.eup %3122  ;;  %v278_v19 = vmul.f32 1.442695, %v262_v44  ;;  %v263_v18 = vsub.f32 %v3975_v6, %v219_v26 }
 0x638   :  { %2860 = vmatprep.mubr.msk.bf16.mxu1 %vm70_vm0, %v1706_v25  ;;  %v222_v1 = vpop.xlane.xlu0 %221  ;;  %v1697_v42 = vmul.f32 %v3123_v15, %v3924_v21 }
 0x639   :  { %v3125_v49 = vpop.eup %3124  ;;  %3132 = vpow2.f32 %v278_v19  ;;  %v280_v47 = vmul.f32 1.442695, %v263_v18  ;;  %v264_v61 = vsub.f32 %v3979_v17, %v222_v1 }
 0x63a   :  { %v225_v62 = vpop.xlane.xlu1 %224  ;;  %v1707_v4 = vpack.c.bf16 %v1697_v42, %v1696_v43  ;;  %v1698_v30 = vmul.f32 %v3125_v49, %v3946_v59 }
 0x63b   :  { %v3127_v24 = vpop.eup %3126  ;;  %3134 = vpow2.f32 %v280_v47  ;;  %v282_v20 = vmul.f32 1.442695, %v264_v61  ;;  %v265_v32 = vsub.f32 %v3984_v11, %v225_v62 }
 0x63c   :  { %2861 = vmatmul.mubr.msk.bf16.gmra.mrb[40].mxu1 %vm70_vm0, %v1707_v4  ;;  %v228_v6 = vpop.xlane.xlu0 %227  ;;  %v1699_v45 = vmul.f32 %v3127_v24, %v3954_v46 }
 0x63d   :  { %v3129_v44 = vpop.eup %3128  ;;  %3136 = vpow2.f32 %v282_v20  ;;  %v284_v26 = vmul.f32 1.442695, %v265_v32  ;;  %v266_v25 = vsub.f32 %v3989_v8, %v228_v6 }
 0x63e   :  { %v231_v17 = vpop.xlane.xlu1 %230  ;;  %v1708_v15 = vpack.c.bf16 %v1699_v45, %v1698_v30  ;;  %v1700_v43 = vmul.f32 %v3129_v44, %v3943_v34 }
 0x63f   :  { %v3131_v19 = vpop.eup %3130  ;;  %3138 = vpow2.f32 %v284_v26  ;;  %v286_v18 = vmul.f32 1.442695, %v266_v25  ;;  %v267_v1 = vsub.f32 %v3994_v13, %v231_v17 }
 0x640   :  { %2864 = vmatprep.mubr.msk.bf16.mxu1 %vm70_vm0, %v1708_v15  ;;  %v234_v11 = vpop.xlane.xlu0 %233  ;;  %v1701_v42 = vmul.f32 %v3131_v19, %v3951_v12  ;;  %v4472_v12 = vmov 1  }
 0x641   :  { %3140 = vpow2.f32 %v286_v18  ;;  %v288_v49 = vmul.f32 1.442695, %v267_v1  ;;  %v268_v47 = vsub.f32 %v3999_v0, %v234_v11 }
 0x642   :  { %v237_v61 = vpop.xlane.xlu1 %236  ;;  %v1709_v8 = vpack.c.bf16 %v1701_v42, %v1700_v43 }
 0x643   :  { %v4082_v62 = vpop.eup %3132  ;;  %3142 = vpow2.f32 %v288_v49  ;;  %v290_v4 = vmul.f32 1.442695, %v268_v47  ;;  %v269_v24 = vsub.f32 %v4004_v3, %v237_v61 }
 0x644   :  { %2865 = vmatmul.mubr.msk.bf16.gmra.mrb[44].mxu1 %vm70_vm0, %v1709_v8  ;;  %v240_v13 = vpop.xlane.xlu0 %239  ;;  %v310_v20 = vsel %vm213_vm1, %v4082_v62, 0.0 }
 0x645   :  { %v4088_v32 = vpop.eup %3134  ;;  %3144 = vpow2.f32 %v290_v4  ;;  %v292_v6 = vmul.f32 1.442695, %v269_v24  ;;  %v270_v0 = vsub.f32 %v4009_v7, %v240_v13  ;;  %311 = vadd.xlane.f32.xlu0 %v310_v20 }
 0x646   :  { %v243_v30 = vpop.xlane.xlu1 %242  ;;  %v313_v45 = vsel %vm213_vm1, %v4088_v32, 0.0 }
 0x647   :  { %v4093_v44 = vpop.eup %3136  ;;  %3146 = vpow2.f32 %v292_v6  ;;  %v294_v3 = vmul.f32 1.442695, %v270_v0  ;;  %v271_v26 = vsub.f32 %v4014_v63, %v243_v30  ;;  %314 = vadd.xlane.f32.xlu1 %v313_v45 }
 0x648   :  { %v246_v25 = vpop.xlane.xlu0 %245  ;;  %v316_v17 = vsel %vm213_vm1, %v4093_v44, 0.0 }
 0x649   :  { %v4098_v15 = vpop.eup %3138  ;;  %3148 = vpow2.f32 %v294_v3  ;;  %v296_v7 = vmul.f32 1.442695, %v271_v26  ;;  %v272_v19 = vsub.f32 %v4019_v10, %v246_v25  ;;  %317 = vadd.xlane.f32.xlu0 %v316_v17 }
 0x64a   :  { %v249_v18 = vpop.xlane.xlu1 %248  ;;  %v319_v1 = vsel %vm213_vm1, %v4098_v15, 0.0 }
 0x64b   :  { %v4103_v11 = vpop.eup %3140  ;;  %3150 = vpow2.f32 %v296_v7  ;;  %v298_v63 = vmul.f32 1.442695, %v272_v19  ;;  %v273_v43 = vsub.f32 %v4024_v54, %v249_v18  ;;  %320 = vadd.xlane.f32.xlu1 %v319_v1 }
 0x64c   :  { %v252_v42 = vpop.xlane.xlu0 %251  ;;  %v322_v49 = vsel %vm213_vm1, %v4103_v11, 0.0 }
 0x64d   :  { %v4108_v47 = vpop.eup %3142  ;;  %3152 = vpow2.f32 %v298_v63  ;;  %v300_v10 = vmul.f32 1.442695, %v273_v43  ;;  %v274_v61 = vsub.f32 %v4029_v58, %v252_v42  ;;  %323 = vadd.xlane.f32.xlu0 %v322_v49 }
 0x64e   :  { %v255_v8 = vpop.xlane.xlu1 %254  ;;  %v325_v4 = vsel %vm213_vm1, %v4108_v47, 0.0 }
 0x64f   :  { %v4113_v24 = vpop.eup %3144  ;;  %3154 = vpow2.f32 %v300_v10  ;;  %v302_v54 = vmul.f32 1.442695, %v274_v61  ;;  %v275_v13 = vsub.f32 %v4034_v53, %v255_v8  ;;  %326 = vadd.xlane.f32.xlu1 %v325_v4  ;;  %v4452_v8 = vmov 0  }
 0x650   :  { %v258_v20 = vpop.xlane.xlu0 %257  ;;  %v328_v6 = vsel %vm213_vm1, %v4113_v24, 0.0  ;;  %2926 = vset.pattern.permute.xlu0 %v4452_v8  ;;  %2927 = vset.pattern.permute.xlu1 %v4452_v8 }
 0x651   :  { %v4118_v0 = vpop.eup %3146  ;;  %3156 = vpow2.f32 %v302_v54  ;;  %v304_v58 = vmul.f32 1.442695, %v275_v13  ;;  %v276_v30 = vsub.f32 %v4039_v57, %v258_v20  ;;  %329 = vadd.xlane.f32.xlu0 %v328_v6  ;;  %v2962_v20 = vld [vmem:[#allocation2 + $0x80] sm:$0xff]   ;;  %v2963_v6 = vld [vmem:[#allocation2 + $0x88] sm:$0xff]  }
 0x652   :  { %v261_v45 = vpop.xlane.xlu1 %260  ;;  %v331_v3 = vsel %vm213_vm1, %v4118_v0, 0.0  ;;  %2868 = vmatprep.subr.bf16.mxu0 %v2962_v20 }
 0x653   :  { %v4123_v26 = vpop.eup %3148  ;;  %3158 = vpow2.f32 %v304_v58  ;;  %v306_v53 = vmul.f32 1.442695, %v276_v30  ;;  %v277_v25 = vsub.f32 %v4044_v23, %v261_v45  ;;  %332 = vadd.xlane.f32.xlu1 %v331_v3  ;;  %2869 = vmatpush3.bf16.msra.mxu0 %v2962_v20  ;;  %v2964_v58 = vld [vmem:[#allocation2 + $0x90] sm:$0xff]   ;;  %v2965_v30 = vld [vmem:[#allocation2 + $0x98] sm:$0xff]   ;;  %v2966_v45 = vld [vmem:[#allocation2 + $0xa0] sm:$0xff]  }
 0x654   :  { %v334_v17 = vsel %vm213_vm1, %v4123_v26, 0.0  ;;  %2870 = vmatprep.subr.bf16.mxu0 %v2963_v6  ;;  %v2967_v3 = vld [vmem:[#allocation2 + $0xa8] sm:$0xff]  }
 0x655   :  { %v4128_v7 = vpop.eup %3150  ;;  %3160 = vpow2.f32 %v306_v53  ;;  %v308_v19 = vmul.f32 1.442695, %v277_v25  ;;  %335 = vadd.xlane.f32.xlu0 %v334_v17  ;;  %v2968_v53 = vld [vmem:[#allocation2 + $0xb0] sm:$0xff]   ;;  %v2969_v25 = vld [vmem:[#allocation2 + $0xb8] sm:$0xff]  }
 0x656   :  { %v337_v57 = vsel %vm213_vm1, %v4128_v7, 0.0 }
 0x657   :  { %v4132_v18 = vpop.eup %3152  ;;  %3162 = vpow2.f32 %v308_v19  ;;  %338 = vadd.xlane.f32.xlu1 %v337_v57  ;;  %2871 = vmatpush3.bf16.msra.mxu0 %v2963_v6 }
 0x658   :  { %v340_v1 = vsel %vm213_vm1, %v4132_v18, 0.0  ;;  %2872 = vmatprep.subr.bf16.mxu0 %v2964_v58 }
 0x659   :  { %v4136_v23 = vpop.eup %3154  ;;  %341 = vadd.xlane.f32.xlu0 %v340_v1 }
 0x65a   :  { %v343_v63 = vsel %vm213_vm1, %v4136_v23, 0.0 }
 0x65b   :  { %v4140_v43 = vpop.eup %3156  ;;  %344 = vadd.xlane.f32.xlu1 %v343_v63  ;;  %2873 = vmatpush3.bf16.msra.mxu0 %v2964_v58 }
 0x65c   :  { %v346_v42 = vsel %vm213_vm1, %v4140_v43, 0.0  ;;  %2874 = vmatprep.subr.bf16.mxu0 %v2965_v30 }
 0x65d   :  { %v4144_v49 = vpop.eup %3158  ;;  %347 = vadd.xlane.f32.xlu0 %v346_v42 }
 0x65e   :  { %v349_v10 = vsel %vm213_vm1, %v4144_v49, 0.0 }
 0x65f   :  { %v4148_v61 = vpop.eup %3160  ;;  %350 = vadd.xlane.f32.xlu1 %v349_v10  ;;  %2875 = vmatpush3.bf16.msra.mxu0 %v2965_v30 }
 0x660   :  { %v352_v4 = vsel %vm213_vm1, %v4148_v61, 0.0  ;;  %2876 = vmatprep.subr.bf16.mxu0 %v2966_v45 }
 0x661   :  { %v4154_v54 = vpop.eup %3162  ;;  %353 = vadd.xlane.f32.xlu0 %v352_v4 }
 0x662   :  { %v355_v13 = vsel %vm213_vm1, %v4154_v54, 0.0 }
 0x663   :  { %356 = vadd.xlane.f32.xlu1 %v355_v13  ;;  %2877 = vmatpush3.bf16.msra.mxu0 %v2966_v45  ;;  %v4454_v45 = vmov 1  }
 0x664   :  { %2878 = vmatprep.subr.bf16.mxu0 %v2967_v3 }
 0x667   :  { %2879 = vmatpush3.bf16.msra.mxu0 %v2967_v3 }
 0x668   :  { %2880 = vmatprep.subr.bf16.mxu0 %v2968_v53 }
 0x66b   :  { %2881 = vmatpush3.bf16.msra.mxu0 %v2968_v53 }
 0x66c   :  { %2882 = vmatprep.subr.bf16.mxu0 %v2969_v25 }
 0x66f   :  { %2883 = vmatpush3.bf16.msra.mxu0 %v2969_v25 }
 0x6d2   :  { %v312_v17 = vpop.xlane.xlu0 %311 }
 0x6d3   :  { %3164 = vrcp.f32 %v312_v17 }
 0x6d4   :  { %v315_v19 = vpop.xlane.xlu1 %314 }
 0x6d5   :  { %3166 = vrcp.f32 %v315_v19 }
 0x6d6   :  { %v318_v57 = vpop.xlane.xlu0 %317 }
 0x6d8   :  { %v321_v1 = vpop.xlane.xlu1 %320 }
 0x6da   :  { %v324_v63 = vpop.xlane.xlu0 %323 }
 0x6dc   :  { %v327_v42 = vpop.xlane.xlu1 %326 }
 0x6dd   :  { %v3165_v10 = vpop.eup %3164  ;;  %3168 = vrcp.f32 %v327_v42 }
 0x6de   :  { %v330_v4 = vpop.xlane.xlu0 %329  ;;  %v359_v13 = vmul.f32 %v3165_v10, %v4082_v62  ;;  %3170 = vrcp.f32 %v318_v57 }
 0x6df   :  { %v3167_v20 = vpop.eup %3166 }
 0x6e0   :  { %1202 = vperm.xlu0 %2926, %v359_v13   ;;  %v361_v6 = vmul.f32 %v3167_v20, %v4088_v32  ;;  %v333_v25 = vpop.xlane.xlu1 %332 }
 0x6e2   :  { %v336_v58 = vpop.xlane.xlu0 %335  ;;  %1207 = vperm.xlu1 %2927, %v361_v6  }
 0x6e3   :  { %3172 = vrcp.f32 %v336_v58 }
 0x6e4   :  { %3174 = vrcp.f32 %v321_v1  ;;  %v339_v42 = vpop.xlane.xlu1 %338 }
 0x6e6   :  { %v342_v30 = vpop.xlane.xlu0 %341  ;;  %2928 = vset.pattern.permute.xlu1 %v4454_v45 }
 0x6e7   :  { %v3169_v3 = vpop.eup %3168  ;;  %2123 = vperm.xlu1 %2928, %v359_v13  }
 0x6e8   :  { %v369_v53 = vmul.f32 %v3169_v3, %v4108_v47  ;;  %v3171_v62 = vpop.eup %3170  ;;  %v4169_v13 = vpop.xlane.xlu1 %344 }
 0x6e9   :  { %v363_v19 = vmul.f32 %v3171_v62, %v4093_v44 }
 0x6ea   :  { %v348_v17 = vpop.xlane.xlu0 %347  ;;  %1227 = vperm.xlu0 %2926, %v369_v53  }
 0x6eb   :  { %3176 = vrcp.f32 %v348_v17  ;;  %2127 = vperm.xlu1 %2928, %v361_v6  }
 0x6ec   :  { %3178 = vrcp.f32 %v330_v4 }
 0x6ed   :  { %v3173_v32 = vpop.eup %3172  ;;  %3180 = vrcp.f32 %v324_v63 }
 0x6ee   :  { %v4164_v57 = vmul.f32 %v3173_v32, %v4123_v26  ;;  %v3175_v1 = vpop.eup %3174  ;;  %3182 = vrcp.f32 %v339_v42  ;;  %v351_v26 = vpop.xlane.xlu1 %350 }
 0x6ef   :  { %2929 = vset.pattern.permute.xlu1 %v4452_v8  ;;  %v365_v47 = vmul.f32 %v3175_v1, %v4098_v15  ;;  %3184 = vrcp.f32 %v342_v30  ;;  %v4180_v15 = vld [vmem:[%s4448_s2 + $0x4] ss:$0 sm:$0xff]  ;;  %v354_v4 = vpop.xlane.xlu0 %353 }
 0x6f0   :  { %1212 = vperm.xlu1 %2929, %v363_v19   ;;  %1242 = vperm.xlu0 %2926, %v4164_v57   ;;  %3186 = vrcp.f32 %v351_v26 }
 0x6f1   :  { %3188 = vrcp.f32 %v333_v25 }
 0x6f2   :  { %3190 = vrcp.f32 %v354_v4 }
 0x6f4   :  { %1217 = vperm.xlu1 %2929, %v365_v47  }
 0x6f5   :  { %v3177_v10 = vpop.eup %3176 }
 0x6f6   :  { %v4172_v44 = vmul.f32 %v3177_v10, %v4140_v43  ;;  %v3179_v20 = vpop.eup %3178 }
 0x6f7   :  { %v3181_v63 = vpop.eup %3180  ;;  %v371_v30 = vmul.f32 %v3179_v20, %v4113_v24 }
 0x6f8   :  { %2930 = vset.pattern.permute.xlu1 %v4454_v45  ;;  %1262 = vperm.xlu0 %2926, %v4172_v44   ;;  %v3183_v3 = vpop.eup %3182  ;;  %v367_v32 = vmul.f32 %v3181_v63, %v4103_v11 }
 0x6f9   :  { %2131 = vperm.xlu1 %2930, %v363_v19   ;;  %v4193_v10 = vmul.f32 %v3183_v3, %v4128_v7  ;;  %v3185_v11 = vpop.eup %3184 }
 0x6fa   :  { %v3187_v7 = vpop.eup %3186 }
 0x6fc   :  { %2939 = vset.pattern.permute.xlu0 %v4454_v45 }
 0x6fd   :  { %2135 = vperm.xlu1 %2930, %v365_v47   ;;  %2143 = vperm.xlu0 %2939, %v369_v53  }
 0x6ff   :  { %v2854_v43 = vpop.f32.mrb[32].mxu1 }
 0x700   :  { %v1798_v6 = vadd.f32 %v2854_v43, %v4180_v15  ;;  %v1789_v58 = vpop.f32.mrb[33].mxu1  ;;  %v4201_v43 = vmul.f32 %v3185_v11, %v4132_v18  ;;  %v3189_v18 = vpop.eup %3188 }
 0x701   :  { %v4185_v17 = vadd.f32 %v4180_v15, %v1789_v58  ;;  %v2855_v62 = vpop.f32.mrb[34].mxu1  ;;  %2931 = vset.pattern.permute.xlu1 %v4452_v8  ;;  %2147 = vperm.xlu0 %2939, %v371_v30   ;;  %v3191_v11 = vpop.eup %3190 }
 0x702   :  { %v1870_v19 = vmul.f32 0.70710677, %v1798_v6  ;;  %v1801_v1 = vadd.f32 %v2855_v62, %v4180_v15  ;;  %v1792_v53 = vpop.f32.mrb[35].mxu1  ;;  %1222 = vperm.xlu1 %2931, %v367_v32  }
 0x703   :  { %v1868_v42 = vmul.f32 0.70710677, %v4185_v17  ;;  %v1793_v24 = vadd.f32 %v4180_v15, %v1792_v53 }
 0x704   :  { %3192 = verf.f32 %v1870_v19  ;;  %v1871_v47 = vmul.f32 0.70710677, %v1801_v1 }
 0x705   :  { %3194 = verf.f32 %v1868_v42  ;;  %v1869_v25 = vmul.f32 0.70710677, %v1793_v24  ;;  %2159 = vperm.xlu0 %2939, %v4193_v10  }
 0x706   :  { %3196 = verf.f32 %v1871_v47  ;;  %2932 = vset.pattern.permute.xlu1 %v4454_v45  ;;  %v4218_v47 = vmul.f32 %v3187_v7, %v4144_v49  ;;  %v4225_v7 = vmul.f32 %v3191_v11, %v4148_v61  ;;  %v1854_v45 = vmul.f32 0.5, %v1798_v6 }
 0x707   :  { %3198 = verf.f32 %v1869_v25  ;;  %v2858_v26 = vpop.f32.mrb[36].mxu1  ;;  %2139 = vperm.xlu1 %2932, %v367_v32  }
 0x708   :  { %v4198_v20 = vadd.f32 %v2858_v26, %v4180_v15  ;;  %v1805_v63 = vpop.f32.mrb[37].mxu1 }
 0x709   :  { %v4204_v4 = vadd.f32 %v4180_v15, %v1805_v63  ;;  %v2859_v58 = vpop.f32.mrb[38].mxu1  ;;  %2163 = vperm.xlu0 %2939, %v4201_v43  }
 0x70a   :  { %v1874_v3 = vmul.f32 0.70710677, %v4198_v20  ;;  %v4208_v62 = vadd.f32 %v2859_v58, %v4180_v15  ;;  %v1808_v19 = vpop.f32.mrb[39].mxu1 }
 0x70b   :  { %v1872_v53 = vmul.f32 0.70710677, %v4204_v4  ;;  %v4213_v32 = vadd.f32 %v4180_v15, %v1808_v19  ;;  %2933 = vset.pattern.permute.xlu1 %v4452_v8 }
 0x70c   :  { %3200 = verf.f32 %v1874_v3  ;;  %v1875_v42 = vmul.f32 0.70710677, %v4208_v62  ;;  %1232 = vperm.xlu1 %2933, %v371_v30   ;;  %v373_v3 = vmul.f32 %v3189_v18, %v4118_v0  ;;  %v1855_v30 = vmul.f32 0.5, %v1801_v1 }
 0x70d   :  { %3202 = verf.f32 %v1872_v53  ;;  %v1873_v25 = vmul.f32 0.70710677, %v4213_v32  ;;  %2175 = vperm.xlu0 %2939, %v4218_v47   ;;  %v1853_v0 = vmul.f32 0.5, %v1793_v24 }
 0x70e   :  { %v3193_v26 = vpop.eup %3192  ;;  %3204 = verf.f32 %v1875_v42 }
 0x70f   :  { %v3195_v63 = vpop.eup %3194  ;;  %v1902_v58 = vadd.f32 1.0, %v3193_v26  ;;  %3206 = verf.f32 %v1873_v25  ;;  %v2862_v49 = vpop.f32.mrb[40].mxu1  ;;  %v1852_v25 = vmul.f32 0.5, %v4185_v17 }
 0x710   :  { %v3197_v19 = vpop.eup %3196  ;;  %3208 = vrcp.f32 %v4169_v13  ;;  %v1900_v8 = vadd.f32 1.0, %v3195_v63  ;;  %v4228_v42 = vadd.f32 %v2862_v49, %v4180_v15  ;;  %v1821_v41 = vpop.f32.mrb[41].mxu1  ;;  %1237 = vperm.xlu1 %2933, %v373_v3  }
 0x711   :  { %v3199_v53 = vpop.eup %3198  ;;  %v1903_v46 = vadd.f32 1.0, %v3197_v19  ;;  %v4232_v13 = vadd.f32 %v4180_v15, %v1821_v41  ;;  %v2863_v26 = vpop.f32.mrb[42].mxu1  ;;  %2179 = vperm.xlu0 %2939, %v4225_v7   ;;  %v1918_v61 = vmul.f32 %v1902_v58, %v1854_v45 }
 0x712   :  { %v1901_v18 = vadd.f32 1.0, %v3199_v53  ;;  %v1878_v6 = vmul.f32 0.70710677, %v4228_v42  ;;  %v4237_v1 = vadd.f32 %v2863_v26, %v4180_v15  ;;  %v1824_v63 = vpop.f32.mrb[43].mxu1  ;;  %v1916_v19 = vmul.f32 %v1900_v8, %v1852_v25 }
 0x713   :  { %v1919_v11 = vmul.f32 %v1903_v46, %v1855_v30  ;;  %v1876_v17 = vmul.f32 0.70710677, %v4232_v13  ;;  %v4241_v24 = vadd.f32 %v4180_v15, %v1824_v63 }
 0x714   :  { %v1917_v49 = vmul.f32 %v1901_v18, %v1853_v0  ;;  %3210 = verf.f32 %v1878_v6  ;;  %v1879_v53 = vmul.f32 0.70710677, %v4237_v1  ;;  %2934 = vset.pattern.permute.xlu1 %v4472_v12 }
 0x715   :  { %v1933_v41 = vpack.c.bf16 %v1919_v11, %v1918_v61  ;;  %3212 = verf.f32 %v1876_v17  ;;  %v1877_v45 = vmul.f32 0.70710677, %v4241_v24  ;;  %2151 = vperm.xlu1 %2934, %v373_v3   ;;  %v1858_v61 = vmul.f32 0.5, %v4198_v20 }
 0x716   :  { %v3201_v46 = vpop.eup %3200  ;;  %v1932_v58 = vpack.c.bf16 %v1917_v49, %v1916_v19  ;;  %3214 = verf.f32 %v1879_v53  ;;  %v1859_v11 = vmul.f32 0.5, %v4208_v62  ;;  %v1856_v19 = vmul.f32 0.5, %v4204_v4 }
 0x717   :  { %v3203_v30 = vpop.eup %3202  ;;  %v1906_v8 = vadd.f32 1.0, %v3201_v46  ;;  %3216 = verf.f32 %v1877_v45  ;;  %v2866_v18 = vpop.f32.mrb[44].mxu1  ;;  %v1857_v49 = vmul.f32 0.5, %v4213_v32 }
 0x718   :  { %v3205_v25 = vpop.eup %3204  ;;  %v1904_v0 = vadd.f32 1.0, %v3203_v30  ;;  %2884 = vmatprep.mubr.bf16.mxu0 %v1932_v58  ;;  %v1846_v63 = vadd.f32 %v2866_v18, %v4180_v15  ;;  %v1837_v17 = vpop.f32.mrb[45].mxu1  ;;  %v4473_v58 = vmov 0  }
 0x719   :  { %v3207_v26 = vpop.eup %3206  ;;  %v1907_v6 = vadd.f32 1.0, %v3205_v25  ;;  %2885 = vmatmul.mubr.bf16.vlgmr.msra.gmra.mrb[48].mxu0 %v1933_v41  ;;  %v1838_v46 = vadd.f32 %v4180_v15, %v1837_v17  ;;  %v2867_v45 = vpop.f32.mrb[46].mxu1  ;;  %2935 = vset.pattern.permute.xlu1 %v4473_v58  ;;  %v1922_v30 = vmul.f32 %v1906_v8, %v1858_v61 }
 0x71a   :  { %v3209_v3 = vpop.eup %3208  ;;  %v1905_v53 = vadd.f32 1.0, %v3207_v26  ;;  %v1882_v37 = vmul.f32 0.70710677, %v1846_v63  ;;  %v1849_v62 = vadd.f32 %v2867_v45, %v4180_v15  ;;  %v1840_v25 = vpop.f32.mrb[47].mxu1  ;;  %1247 = vperm.xlu1 %2935, %v4193_v10   ;;  %v1920_v41 = vmul.f32 %v1904_v0, %v1856_v19 }
 0x71b   :  { %v1923_v20 = vmul.f32 %v1907_v6, %v1859_v11  ;;  %v1880_v59 = vmul.f32 0.70710677, %v1838_v46  ;;  %v1841_v4 = vadd.f32 %v4180_v15, %v1840_v25  ;;  %v1860_v6 = vmul.f32 0.5, %v4232_v13 }
 0x71c   :  { %v1921_v18 = vmul.f32 %v1905_v53, %v1857_v49  ;;  %3218 = verf.f32 %v1882_v37  ;;  %v1883_v32 = vmul.f32 0.70710677, %v1849_v62  ;;  %v1862_v37 = vmul.f32 0.5, %v4228_v42 }
 0x71d   :  { %v1935_v26 = vpack.c.bf16 %v1923_v20, %v1922_v30  ;;  %3220 = verf.f32 %v1880_v59  ;;  %v1881_v17 = vmul.f32 0.70710677, %v1841_v4  ;;  %v1863_v59 = vmul.f32 0.5, %v4237_v1 }
 0x71e   :  { %v1934_v34 = vpack.c.bf16 %v1921_v18, %v1920_v41  ;;  %v3211_v40 = vpop.eup %3210  ;;  %3222 = verf.f32 %v1883_v32  ;;  %2936 = vset.pattern.permute.xlu1 %v4472_v12  ;;  %v1861_v19 = vmul.f32 0.5, %v4241_v24  ;;  %v381_v42 = vmul.f32 %v3209_v3, %v4136_v23  ;;  %v357_v3 = vpop.xlane.xlu1 %356 }
 0x71f   :  { %v3213_v8 = vpop.eup %3212  ;;  %v1910_v61 = vadd.f32 1.0, %v3211_v40  ;;  %3224 = verf.f32 %v1881_v17  ;;  %2155 = vperm.xlu1 %2936, %v4164_v57   ;;  %v1866_v18 = vmul.f32 0.5, %v1846_v63  ;;  %v1867_v32 = vmul.f32 0.5, %v1849_v62  ;;  %v2970_v62 = vld [vmem:[#allocation2 + $0xc0] sm:$0xff]  }
 0x720   :  { %2888 = vmatprep.mubr.bf16.mxu0 %v1934_v34  ;;  %v3215_v10 = vpop.eup %3214  ;;  %v1908_v0 = vadd.f32 1.0, %v3213_v8  ;;  %v1864_v17 = vmul.f32 0.5, %v1838_v46  ;;  %v1865_v8 = vmul.f32 0.5, %v1841_v4  ;;  %3226 = vrcp.f32 %v357_v3  ;;  %2900 = vmatprep.subr.bf16.mxu1 %v2970_v62  ;;  %v2971_v4 = vld [vmem:[#allocation2 + $0xc8] sm:$0xff]  }
 0x721   :  { %2889 = vmatmul.mubr.bf16.gmra.mrb[52].mxu0 %v1935_v26  ;;  %v3217_v15 = vpop.eup %3216  ;;  %v1911_v11 = vadd.f32 1.0, %v3215_v10  ;;  %v1926_v53 = vmul.f32 %v1910_v61, %v1862_v37  ;;  %2901 = vmatpush3.bf16.msra.mxu1 %v2970_v62 }
 0x722   :  { %v1909_v49 = vadd.f32 1.0, %v3217_v15  ;;  %v1924_v57 = vmul.f32 %v1908_v0, %v1860_v6  ;;  %2902 = vmatprep.subr.bf16.mxu1 %v2971_v4 }
 0x723   :  { %v1927_v40 = vmul.f32 %v1911_v11, %v1863_v59  ;;  %2937 = vset.pattern.permute.xlu1 %v4473_v58 }
 0x724   :  { %v1925_v34 = vmul.f32 %v1909_v49, %v1861_v19  ;;  %1252 = vperm.xlu1 %2937, %v4201_v43  }
 0x725   :  { %v1937_v45 = vpack.c.bf16 %v1927_v40, %v1926_v53  ;;  %2903 = vmatpush3.bf16.msra.mxu1 %v2971_v4 }
 0x726   :  { %v3219_v30 = vpop.eup %3218  ;;  %v1936_v20 = vpack.c.bf16 %v1925_v34, %v1924_v57 }
 0x727   :  { %v3221_v1 = vpop.eup %3220  ;;  %v1914_v25 = vadd.f32 1.0, %v3219_v30 }
 0x728   :  { %v3223_v41 = vpop.eup %3222  ;;  %v1912_v13 = vadd.f32 1.0, %v3221_v1  ;;  %2892 = vmatprep.mubr.bf16.mxu0 %v1936_v20  ;;  %1257 = vperm.xlu1 %2937, %v381_v42  }
 0x729   :  { %v3225_v24 = vpop.eup %3224  ;;  %v1915_v26 = vadd.f32 1.0, %v3223_v41  ;;  %2893 = vmatmul.mubr.bf16.gmra.mrb[56].mxu0 %v1937_v45  ;;  %v1930_v43 = vmul.f32 %v1914_v25, %v1866_v18  ;;  %v4299_v25 = vld [vmem:[%s4448_s2 + $0x5] ss:$0 sm:$0xff] }
 0x72a   :  { %v1913_v61 = vadd.f32 1.0, %v3225_v24  ;;  %v1928_v0 = vmul.f32 %v1912_v13, %v1864_v17  ;;  %v3227_v63 = vpop.eup %3226 }
 0x72b   :  { %v1931_v10 = vmul.f32 %v1915_v26, %v1867_v32  ;;  %v389_v46 = vmul.f32 %v3227_v63, %v4154_v54 }
 0x72c   :  { %v1929_v15 = vmul.f32 %v1913_v61, %v1865_v8  ;;  %2938 = vset.pattern.permute.xlu1 %v4472_v12 }
 0x72d   :  { %2167 = vperm.xlu1 %2938, %v381_v42   ;;  %v1939_v23 = vpack.c.bf16 %v1931_v10, %v1930_v43 }
 0x72e   :  { %v1938_v37 = vpack.c.bf16 %v1929_v15, %v1928_v0 }
 0x730   :  { %2896 = vmatprep.mubr.bf16.mxu0 %v1938_v37 }
 0x731   :  { %2897 = vmatmul.mubr.bf16.gmra.mrb[60].mxu0 %v1939_v23  ;;  %2940 = vset.pattern.permute.xlu1 %v4473_v58 }
 0x732   :  { %1267 = vperm.xlu1 %2940, %v4218_v47  }
 0x736   :  { %2941 = vset.pattern.permute.xlu1 %v4472_v12 }
 0x737   :  { %2171 = vperm.xlu1 %2941, %v4172_v44  }
 0x73b   :  { %2942 = vset.pattern.permute.xlu1 %v4473_v58 }
 0x73c   :  { %1272 = vperm.xlu1 %2942, %v4225_v7  }
 0x740   :  { %1277 = vperm.xlu1 %2942, %v389_v46  }
 0x744   :  { %2943 = vset.pattern.permute.xlu1 %v4472_v12 }
 0x745   :  { %2183 = vperm.xlu1 %2943, %v389_v46  }
 0x75f   :  { %v1203_v57 = vpop.permute.xlu0 %1202 }
 0x760   :  { %v1280_v63 = vmul.f32 %v1203_v57, %v3723_v27 }
 0x761   :  { %v1208_v47 = vpop.permute.xlu1 %1207 }
 0x766   :  { %v2124_v59 = vpop.permute.xlu1 %2123 }
 0x769   :  { %v4286_v45 = vpop.permute.xlu0 %1227 }
 0x76a   :  { %v2128_v44 = vpop.permute.xlu1 %2127 }
 0x76f   :  { %v1213_v11 = vpop.permute.xlu1 %1212  ;;  %v4288_v30 = vpop.permute.xlu0 %1242 }
 0x770   :  { %v1282_v15 = vmul.f32 %v1213_v11, %v3720_v52 }
 0x773   :  { %v1218_v6 = vpop.permute.xlu1 %1217 }
 0x777   :  { %v4292_v42 = vpop.permute.xlu0 %1262 }
 0x778   :  { %v2132_v58 = vpop.permute.xlu1 %2131 }
 0x77c   :  { %v2136_v19 = vpop.permute.xlu1 %2135  ;;  %v2144_v41 = vpop.permute.xlu0 %2143 }
 0x780   :  { %v2148_v23 = vpop.permute.xlu0 %2147 }
 0x781   :  { %v4274_v7 = vpop.permute.xlu1 %1222 }
 0x786   :  { %v4276_v54 = vpop.permute.xlu1 %2139 }
 0x78b   :  { %v1233_v49 = vpop.permute.xlu1 %1232 }
 0x78f   :  { %v4278_v12 = vpop.permute.xlu1 %1237 }
 0x794   :  { %v4280_v53 = vpop.permute.xlu1 %2151 }
 0x799   :  { %v4282_v40 = vpop.permute.xlu1 %1247 }
 0x79e   :  { %v4284_v34 = vpop.permute.xlu1 %2155 }
 0x7a3   :  { %v4290_v20 = vpop.permute.xlu1 %1252 }
 0x7a7   :  { %v4294_v1 = vpop.permute.xlu1 %1257 }
 0x7ac   :  { %v4301_v24 = vpop.permute.xlu1 %2167 }
 0x7b1   :  { %v4314_v4 = vpop.permute.xlu1 %1267 }
 0x7ec   :  { %v2886_v13 = vpop.f32.mrb[48].mxu0 }
 0x7ed   :  { %v2052_v18 = vadd.f32 %v2886_v13, %v4299_v25  ;;  %v2043_v32 = vpop.f32.mrb[49].mxu0 }
 0x7ee   :  { %v2044_v26 = vadd.f32 %v4299_v25, %v2043_v32  ;;  %v2887_v17 = vpop.f32.mrb[50].mxu0 }
 0x7ef   :  { %v2108_v8 = vadd.f32 %v2052_v18, %v3861_v51  ;;  %v2055_v61 = vadd.f32 %v2887_v17, %v4299_v25  ;;  %v2046_v43 = vpop.f32.mrb[51].mxu0  ;;  %v1283_v51 = vmul.f32 %v1218_v6, %v3727_v29  ;;  %v3228_v29 = vld [vmem:[%s4446_s0 + $0x10] sm:$0xff] }
 0x7f0   :  { %v2106_v10 = vadd.f32 %v2044_v26, %v3864_v48  ;;  %v2047_v0 = vadd.f32 %v4299_v25, %v2046_v43  ;;  %v1281_v48 = vmul.f32 %v1208_v47, %v3730_v36  ;;  %v3229_v36 = vld [vmem:[%s4446_s0 + $0x18] sm:$0xff]  ;;  %v3231_v43 = vld [vmem:[%s4446_s0 + $0x8] sm:$0xff] }
 0x7f1   :  { %v2188_v3 = vmul.f32 %v2132_v58, %v2108_v8  ;;  %v2109_v37 = vadd.f32 %v2055_v61, %v3868_v55  ;;  %v3230_v8 = vld [vmem:[%s4446_s0] sm:$0xff] }
 0x7f2   :  { %v2186_v46 = vmul.f32 %v2124_v59, %v2106_v10  ;;  %v2107_v62 = vadd.f32 %v2047_v0, %v3871_v56  ;;  %v4319_v56 = vpop.permute.xlu0 %2159 }
 0x7f3   :  { %v2204_v13 = vadd.f32 %v2188_v3, %v1282_v15  ;;  %v2189_v18 = vmul.f32 %v2136_v19, %v2109_v37  ;;  %v1286_v3 = vmul.f32 %v1233_v49, %v3746_v35  ;;  %v1285_v49 = vmul.f32 %v4286_v45, %v3757_v38  ;;  %v3233_v38 = vld [vmem:[%s4446_s0 + $0x38] sm:$0xff] }
 0x7f4   :  { %v2202_v32 = vadd.f32 %v2186_v46, %v1280_v63  ;;  %v2187_v26 = vmul.f32 %v2128_v44, %v2107_v62  ;;  %v2890_v52 = vpop.f32.mrb[52].mxu0  ;;  %v1284_v62 = vmul.f32 %v4274_v7, %v3749_v33 }
 0x7f5   :  { %v2205_v11 = vadd.f32 %v2189_v18, %v1283_v51  ;;  %v2068_v58 = vadd.f32 %v2890_v52, %v4299_v25  ;;  %v2059_v55 = vpop.f32.mrb[53].mxu0  ;;  %v2220_v6 = vadd.f32 %v3228_v29, %v2204_v13 }
 0x7f6   :  { %v2203_v17 = vadd.f32 %v2187_v26, %v1281_v48  ;;  %v2060_v27 = vadd.f32 %v4299_v25, %v2059_v55  ;;  %v2891_v59 = vpop.f32.mrb[54].mxu0  ;;  %v2218_v61 = vadd.f32 %v3230_v8, %v2202_v32  ;;  %v3235_v55 = vld [vmem:[%s4446_s0 + $0x28] sm:$0xff] }
 0x7f7   :  { %v2221_v47 = vadd.f32 %v3229_v36, %v2205_v11  ;;  %v2112_v44 = vadd.f32 %v2068_v58, %v3887_v50  ;;  %v2071_v19 = vadd.f32 %v2891_v59, %v4299_v25  ;;  %v2062_v57 = vpop.f32.mrb[55].mxu0  ;;  %v4338_v50 = vpop.permute.xlu1 %2171  ;;  %v3234_v11 = vld [vmem:[%s4446_s0 + $0x20] sm:$0xff] }
 0x7f8   :  { %v2219_v10 = vadd.f32 %v3231_v43, %v2203_v17  ;;  %v2110_v0 = vadd.f32 %v2060_v27, %v3890_v31  ;;  %v2063_v15 = vadd.f32 %v4299_v25, %v2062_v57  ;;  %v1287_v31 = vmul.f32 %v4278_v12, %v3754_v28  ;;  %v3232_v12 = vld [vmem:[%s4446_s0 + $0x30] sm:$0xff] }
 0x7f9   :  { %v2235_v37 = vpack.c.bf16 %v2221_v47, %v2220_v6  ;;  %v2192_v63 = vmul.f32 %v2148_v23, %v2112_v44  ;;  %v2113_v46 = vadd.f32 %v2071_v19, %v3895_v14  ;;  %v2164_v14 = vpop.permute.xlu0 %2163  ;;  %v1290_v44 = vmul.f32 %v4290_v20, %v3775_v9  ;;  %v4474_v9 = vld [vmem:[#allocation8_spill] sm:$0xff] }
 0x7fa   :  { %v2190_v51 = vmul.f32 %v4276_v54, %v2110_v0  ;;  %v2111_v13 = vadd.f32 %v2063_v15, %v3898_v16  ;;  %v2234_v18 = vpack.c.bf16 %v2219_v10, %v2218_v61  ;;  %v1288_v61 = vmul.f32 %v4288_v30, %v3778_v5 }
 0x7fb   :  { %v2208_v48 = vadd.f32 %v2192_v63, %v1286_v3  ;;  %v2193_v35 = vmul.f32 %v4280_v53, %v2113_v46  ;;  %v1273_v28 = vpop.permute.xlu1 %1272  ;;  %v3236_v63 = vld [vmem:[%s4446_s0 + $0x50] sm:$0xff] }
 0x7fc   :  { %v2206_v23 = vadd.f32 %v2190_v51, %v1284_v62  ;;  %v2191_v32 = vmul.f32 %v2144_v41, %v2111_v13  ;;  %2904 = vmatprep.mubr.msk.bf16.mxu1 %vm70_vm0, %v2234_v18  ;;  %v2894_v7 = vpop.f32.mrb[56].mxu0  ;;  %v4475_v62 = vld [vmem:[#allocation13_spill] sm:$0xff] }
 0x7fd   :  { %v2209_v33 = vadd.f32 %v2193_v35, %v1287_v31  ;;  %2905 = vmatmul.mubr.msk.bf16.vlgmr.msra.gmra.mrb[48].mxu1 %vm70_vm0, %v2235_v37  ;;  %v2084_v54 = vadd.f32 %v2894_v7, %v4299_v25  ;;  %v2075_v26 = vpop.f32.mrb[57].mxu0  ;;  %v2224_v53 = vadd.f32 %v3232_v12, %v2208_v48  ;;  %v2176_v43 = vpop.permute.xlu0 %2175  ;;  %v3238_v48 = vld [vmem:[%s4446_s0 + $0x40] sm:$0xff]  ;;  %v4477_v7 = vld [vmem:[#allocation9_spill] sm:$0xff] }
 0x7fe   :  { %v2207_v16 = vadd.f32 %v2191_v32, %v1285_v49  ;;  %v2076_v41 = vadd.f32 %v4299_v25, %v2075_v26  ;;  %v2895_v52 = vpop.f32.mrb[58].mxu0  ;;  %v2222_v58 = vadd.f32 %v3234_v11, %v2206_v23  ;;  %v3239_v49 = vld [vmem:[%s4446_s0 + $0x48] sm:$0xff]  ;;  %v4476_v32 = vld [vmem:[#allocation14_spill] sm:$0xff]  ;;  %v4478_v26 = vld [vmem:[#allocation15_spill] sm:$0xff] }
 0x7ff   :  { %v2225_v45 = vadd.f32 %v3233_v38, %v2209_v33  ;;  %v2116_v27 = vadd.f32 %v2084_v54, %v3916_v60  ;;  %v2087_v59 = vadd.f32 %v2895_v52, %v4299_v25  ;;  %v2078_v29 = vpop.f32.mrb[59].mxu0  ;;  %v1278_v20 = vpop.permute.xlu1 %1277  ;;  %v4479_v38 = vld [vmem:[#allocation10_spill] sm:$0xff]  ;;  %v4480_v11 = vld [vmem:[#allocation16_spill] sm:$0xff] }
 0x800   :  { %v2223_v17 = vadd.f32 %v3235_v55, %v2207_v16  ;;  %v2114_v6 = vadd.f32 %v2076_v41, %v3919_v22  ;;  %v2079_v36 = vadd.f32 %v4299_v25, %v2078_v29  ;;  %v1291_v22 = vmul.f32 %v4294_v1, %v3783_v39 }
 0x801   :  { %v2237_v47 = vpack.c.bf16 %v2225_v45, %v2224_v53  ;;  %v2196_v19 = vmul.f32 %v2164_v14, %v2116_v27  ;;  %v2117_v57 = vadd.f32 %v2087_v59, %v3924_v21  ;;  %v1289_v21 = vmul.f32 %v4282_v40, %v4474_v9  ;;  %v2180_v31 = vpop.permute.xlu0 %2179 }
 0x802   :  { %v2236_v8 = vpack.c.bf16 %v2223_v17, %v2222_v58  ;;  %v2194_v60 = vmul.f32 %v4284_v34, %v2114_v6  ;;  %v2115_v10 = vadd.f32 %v2079_v36, %v3927_v2  ;;  %v1294_v16 = vmul.f32 %v1273_v28, %v4477_v7  ;;  %v4481_v17 = vld [vmem:[#allocation11_spill] sm:$0xff] }
 0x803   :  { %v2212_v0 = vadd.f32 %v2196_v19, %v1290_v44  ;;  %v2197_v15 = vmul.f32 %v4301_v24, %v2117_v57  ;;  %v1292_v45 = vmul.f32 %v4292_v42, %v4479_v38  ;;  %v2184_v41 = vpop.permute.xlu1 %2183  ;;  %v1295_v27 = vmul.f32 %v1278_v20, %v4481_v17  ;;  %v3241_v19 = vld [vmem:[%s4446_s0 + $0x78] sm:$0xff] }
 0x804   :  { %2908 = vmatprep.mubr.msk.bf16.mxu1 %vm70_vm0, %v2236_v8  ;;  %v2210_v3 = vadd.f32 %v2194_v60, %v1288_v61  ;;  %v2195_v5 = vmul.f32 %v4319_v56, %v2115_v10  ;;  %v2898_v30 = vpop.f32.mrb[60].mxu0  ;;  %v3237_v56 = vld [vmem:[%s4446_s0 + $0x58] sm:$0xff]  ;;  %v3243_v61 = vld [vmem:[%s4446_s0 + $0x68] sm:$0xff] }
 0x805   :  { %2909 = vmatmul.mubr.msk.bf16.gmra.mrb[52].mxu1 %vm70_vm0, %v2237_v47  ;;  %v2213_v34 = vadd.f32 %v2197_v15, %v1291_v22  ;;  %v2100_v2 = vadd.f32 %v2898_v30, %v4299_v25  ;;  %v2091_v37 = vpop.f32.mrb[61].mxu0  ;;  %v2228_v40 = vadd.f32 %v3236_v63, %v2212_v0  ;;  %v2554_v0 = vld [vmem:[%s4448_s2 + $0x6] ss:$0 sm:$0xff] }
 0x806   :  { %v2211_v39 = vadd.f32 %v2195_v5, %v1289_v21  ;;  %v2092_v1 = vadd.f32 %v4299_v25, %v2091_v37  ;;  %v2899_v24 = vpop.f32.mrb[62].mxu0  ;;  %v2226_v35 = vadd.f32 %v3238_v48, %v2210_v3 }
 0x807   :  { %v2229_v46 = vadd.f32 %v3237_v56, %v2213_v34  ;;  %v2120_v51 = vadd.f32 %v2100_v2, %v4475_v62  ;;  %v2103_v13 = vadd.f32 %v2899_v24, %v4299_v25  ;;  %v2094_v18 = vpop.f32.mrb[63].mxu0 }
 0x808   :  { %v2227_v23 = vadd.f32 %v3239_v49, %v2211_v39  ;;  %v2118_v14 = vadd.f32 %v2092_v1, %v4476_v32  ;;  %v2095_v33 = vadd.f32 %v4299_v25, %v2094_v18  ;;  %v4482_v25 = vld [vmem:[#allocation12_spill] sm:$0xff] }
 0x809   :  { %v2200_v54 = vmul.f32 %v2180_v31, %v2120_v51  ;;  %v2121_v12 = vadd.f32 %v2103_v13, %v4478_v26  ;;  %v2239_v53 = vpack.c.bf16 %v2229_v46, %v2228_v40  ;;  %v1293_v28 = vmul.f32 %v4314_v4, %v4482_v25  ;;  %v3242_v4 = vld [vmem:[%s4446_s0 + $0x60] sm:$0xff] }
 0x80a   :  { %v2198_v52 = vmul.f32 %v4338_v50, %v2118_v14  ;;  %v2119_v58 = vadd.f32 %v2095_v33, %v4480_v11  ;;  %v2238_v55 = vpack.c.bf16 %v2227_v23, %v2226_v35  ;;  %v3240_v50 = vld [vmem:[%s4446_s0 + $0x70] sm:$0xff]  ;;  %s3297_s0 = smov [#allocation5]  }
 0x80b   :  { %v2216_v59 = vadd.f32 %v2200_v54, %v1294_v16  ;;  %v2201_v29 = vmul.f32 %v2184_v41, %v2121_v12  ;;  %s2469_s2 = sshll.u32 %s3297_s0, 4  ;;  %s2470_s2 = int_to_ptr.vmem [resolvable:$true] %s2469_s2 }
 0x80c   :  { %v2214_v6 = vadd.f32 %v2198_v52, %v1292_v45  ;;  %v2199_v36 = vmul.f32 %v2176_v43, %v2119_v58  ;;  %2912 = vmatprep.mubr.msk.bf16.mxu1 %vm70_vm0, %v2238_v55  ;;  %s3266_s28 = scalar_lea.vmem %s2470_s2, 1024  ;;  %p3271_p9 = scmp.lt.s32.totalorder %s2470_s2, %s2470_s2 }
 0x80d   :  { %v2217_v47 = vadd.f32 %v2201_v29, %v1295_v27  ;;  %2913 = vmatmul.mubr.msk.bf16.gmra.mrb[56].mxu1 %vm70_vm0, %v2239_v53  ;;  %v2232_v44 = vadd.f32 %v3240_v50, %v2216_v59  ;;  %p3267_p8 = scmp.ne.s32.totalorder %s2470_s2, %s3266_s28  ;;  %p3272_p10 = scmp.lt.s32.totalorder %s3266_s28, %s3266_s28 }
 0x80e   :  { %v2215_v42 = vadd.f32 %v2199_v36, %v1293_v28  ;;  %v2230_v8 = vadd.f32 %v3242_v4, %v2214_v6 }
 0x80f   :  { %v2233_v57 = vadd.f32 %v3241_v19, %v2217_v47  ;;  %p3273_p11 = por %p3272_p10, %p3271_p9 }
 0x810   :  { %v2231_v43 = vadd.f32 %v3243_v61, %v2215_v42 }
 0x811   :  { %v2241_v60 = vpack.c.bf16 %v2233_v57, %v2232_v44  ;;  %p3274_p12 = pnand %p3273_p11, %p3267_p8 }
 0x812   :  { %v2240_v10 = vpack.c.bf16 %v2231_v43, %v2230_v8 }
 0x814   :  { %2916 = vmatprep.mubr.msk.bf16.mxu1 %vm70_vm0, %v2240_v10 }
 0x815   :  { %2917 = vmatmul.mubr.msk.bf16.gmra.mrb[60].mxu1 %vm70_vm0, %v2241_v60 }
 0x8d0   :  { %v2906_v22 = vpop.f32.mrb[48].mxu1 }
 0x8d1   :  { %v2321_v15 = vpop.f32.mrb[49].mxu1  ;;  %v2330_v21 = vadd.f32 %v2906_v22, %v2554_v0 }
 0x8d2   :  { %v2907_v9 = vpop.f32.mrb[50].mxu1  ;;  %v2322_v5 = vadd.f32 %v2554_v0, %v2321_v15 }
 0x8d3   :  { %v2333_v20 = vadd.f32 %v2907_v9, %v2554_v0  ;;  %v2324_v3 = vpop.f32.mrb[51].mxu1 }
 0x8d4   :  { %v2325_v30 = vadd.f32 %v2554_v0, %v2324_v3 }
 0x8d5   :  { %v2605_v34 = vpack.c.bf16 %v2333_v20, %v2330_v21 }
 0x8d6   :  { %v2600_v2 = vpack.c.bf16 %v2325_v30, %v2322_v5 }
 0x8d7   :  { %2637 = vst [vmem:[#allocation5 + $0x8] sm:$0xff] %v2605_v34  }
 0x8d8   :  { %2601 = vst [vmem:[#allocation5] sm:$0xff] %v2600_v2   ;;  %v2910_v37 = vpop.f32.mrb[52].mxu1 }
 0x8d9   :  { %v2337_v39 = vpop.f32.mrb[53].mxu1  ;;  %v2346_v24 = vadd.f32 %v2910_v37, %v2554_v0 }
 0x8da   :  { %v2911_v1 = vpop.f32.mrb[54].mxu1  ;;  %v2338_v56 = vadd.f32 %v2554_v0, %v2337_v39 }
 0x8db   :  { %v2349_v63 = vadd.f32 %v2911_v1, %v2554_v0  ;;  %v2340_v40 = vpop.f32.mrb[55].mxu1 }
 0x8dc   :  { %v2341_v46 = vadd.f32 %v2554_v0, %v2340_v40 }
 0x8dd   :  { %v2615_v62 = vpack.c.bf16 %v2349_v63, %v2346_v24 }
 0x8de   :  { %v2610_v51 = vpack.c.bf16 %v2341_v46, %v2338_v56 }
 0x8df   :  { %2639 = vst [vmem:[#allocation5 + $0x18] sm:$0xff] %v2615_v62  }
 0x8e0   :  { %2638 = vst [vmem:[#allocation5 + $0x10] sm:$0xff] %v2610_v51   ;;  %v2914_v13 = vpop.f32.mrb[56].mxu1 }
 0x8e1   :  { %v2353_v18 = vpop.f32.mrb[57].mxu1  ;;  %v2362_v48 = vadd.f32 %v2914_v13, %v2554_v0 }
 0x8e2   :  { %v2915_v31 = vpop.f32.mrb[58].mxu1  ;;  %v2354_v23 = vadd.f32 %v2554_v0, %v2353_v18 }
 0x8e3   :  { %v2365_v35 = vadd.f32 %v2915_v31, %v2554_v0  ;;  %v2356_v49 = vpop.f32.mrb[59].mxu1 }
 0x8e4   :  { %v2357_v32 = vadd.f32 %v2554_v0, %v2356_v49 }
 0x8e5   :  { %v2625_v14 = vpack.c.bf16 %v2365_v35, %v2362_v48 }
 0x8e6   :  { %v2620_v33 = vpack.c.bf16 %v2357_v32, %v2354_v23 }
 0x8e7   :  { %2641 = vst [vmem:[#allocation5 + $0x28] sm:$0xff] %v2625_v14  }
 0x8e8   :  { %2640 = vst [vmem:[#allocation5 + $0x20] sm:$0xff] %v2620_v33   ;;  %v2918_v7 = vpop.f32.mrb[60].mxu1 }
 0x8e9   :  { %v2369_v16 = vpop.f32.mrb[61].mxu1  ;;  %v2378_v26 = vadd.f32 %v2918_v7, %v2554_v0 }
 0x8ea   :  { %v2919_v54 = vpop.f32.mrb[62].mxu1  ;;  %v2370_v38 = vadd.f32 %v2554_v0, %v2369_v16 }
 0x8eb   :  { %v2381_v12 = vadd.f32 %v2919_v54, %v2554_v0  ;;  %v2372_v53 = vpop.f32.mrb[63].mxu1 }
 0x8ec   :  { %v2373_v45 = vadd.f32 %v2554_v0, %v2372_v53 }
 0x8ed   :  { %v2635_v41 = vpack.c.bf16 %v2381_v12, %v2378_v26 }
 0x8ee   :  { %v2630_v52 = vpack.c.bf16 %v2373_v45, %v2370_v38 }
 0x8ef   :  { %2643 = vst [vmem:[#allocation5 + $0x38] sm:$0xff] %v2635_v41  }
 0x8f0   :  { %2642 = vst [vmem:[#allocation5 + $0x30] sm:$0xff] %v2630_v52  }
 0x8f1   :  { %3277 = shalt.err (!%p3274_p12)
}
 0x8f2   :  { %s3278_s4 = scalar_lea.hbm %s4449_s3, 1024 }
 0x8f3   :  { %p3279_p13 = scmp.ne.s32.totalorder %s4449_s3, %s3278_s4  ;;  %p3282_p0 = scmp.lt.u32.totalorder %s3278_s4, %s4449_s3 }
 0x8f5   :  { %p3284_p1 = pnand %p3282_p0, %p3279_p13 }
 0x8f7   :  { %3287 = shalt.err (!%p3284_p1)
}
 0x8f8   :  { %2475 = dma.vmem_to_hbm [thread:$0]  %s2470_s2, 1024, %s4449_s3, [#allocation4], %s3293_s22, %s3293_s22, %s3294_s23  }
 0x8f9   :  { %3290 = dma.done.wait [#allocation4], 1024  }
 0x8fa   :  { %3291 = vsyncadd [#allocation4], 4294966272 }
 0x8fb   :  { %2479 = vsyncpa [#allocation3], 1 }
 0x8fc   :  { %2480 = vsyncpa [#allocation4], 1 }

</bundles_post_ra>
